<compile_context>
chip_gen: v7x
topology: tpu7x:2x2x1
jax: 0.10.0
libtpu: 0.0.40
codegen_flags: <defaults>
</compile_context>

<pallas_src>
import math
from functools import partial

import jax
import jax.numpy as jnp
from jax.experimental import pallas as pl
from jax.experimental.pallas import tpu as pltpu

LOWER_LIMIT = -20.0
UPPER_LIMIT = 20.0
DELTA = 2.0
ETA = 2.0
K = int((UPPER_LIMIT - LOWER_LIMIT) // DELTA)   # expansion factor = 20
PACK = 128                                      # scalars per packed row -> 2560 output lanes


def _round_up(x, m):
    return ((x + m - 1) // m) * m


def _fta_kernel(z_ref, e_ref, c_ref, o_ref, *, delta, eta):
    # z_ref: (tm, P)      f32 input scalars, P per row
    # e_ref: (3P, P*K)    bf16 stacked one-hot expansion matrix
    # c_ref: (1, P*K)     f32 tiled centers, c_tiled[d*K + j] = c[j]
    # o_ref: (tm, P*K)    expanded features (lane-dense)
    z = z_ref[...]

    # Exact 3-way bf16 split: z == z_hi + z_mid + z_lo bit-exactly.
    z_hi = z.astype(jnp.bfloat16)
    r1 = z - z_hi.astype(jnp.float32)
    z_mid = r1.astype(jnp.bfloat16)
    z_lo = (r1 - z_mid.astype(jnp.float32)).astype(jnp.bfloat16)

    # Single fused MXU matmul: zrep[:, d*K + j] == z[:, d], exactly.
    lhs = jnp.concatenate([z_hi, z_mid, z_lo], axis=1)                 # (tm, 3P) bf16
    zrep = jnp.dot(lhs, e_ref[...], preferred_element_type=jnp.float32)

    c = c_ref[...]
    a = c - zrep                    # c - z
    b = (zrep - delta) - c          # z - delta - c   (same association as torch)
    # clip(a,0) + clip(b,0) == max(a, b, 0): the two terms are mutually
    # exclusive because delta > 0, so this is bit-exact.
    u = jnp.maximum(jnp.maximum(a, b), 0.0)
    # 1 - [(u<=eta)*u + (u>eta)]  ==  where(u<=eta, 1-u, 0)
    o_ref[...] = jnp.where(u <= eta, 1.0 - u, 0.0).astype(o_ref.dtype)


def fta(z, *, block_rows=512, pack=PACK, out_dtype=None):
    """Pallas FTA forward. z: (..., D) -> (..., D*K). Default out_dtype float32."""
    orig_shape = z.shape
    D = orig_shape[-1]
    R = math.prod(orig_shape)
    P = pack
    KP = P * K
    out_dtype = jnp.float32 if out_dtype is None else out_dtype

    # Pack the row-major flattened input, P scalars per row.
    rows = pl.cdiv(R, P)
    # Row tile: >= 8 (sublane granularity), <= block_rows, and small enough to
    # give >= ~4 grid steps so both v7x TensorCores get work.
    tm = max(8, min(block_rows, _round_up(pl.cdiv(rows, 4), 8)))
    rows_p = _round_up(rows, tm)          # pad so the grid divides evenly
    grid = (rows_p // tm,)

    z_flat = jnp.ravel(z).astype(jnp.float32)
    pad = rows_p * P - R
    if pad:
        z_flat = jnp.pad(z_flat, (0, pad))   # padded rows are sliced away below
    z2 = z_flat.reshape(rows_p, P)

    # Stacked one-hot expansion matrix E3[q*P + d, d*K + j] = 1 (0/1 exact bf16).
    d_idx = jnp.arange(P, dtype=jnp.int32)[:, None]
    j_idx = jnp.arange(KP, dtype=jnp.int32)[None, :]
    e = jnp.where(j_idx // K == d_idx, 1.0, 0.0).astype(jnp.bfloat16)   # (P, P*K)
    e3 = jnp.concatenate([e, e, e], axis=0)                             # (3P, P*K)

    # Tiled centers: c_tiled[0, d*K + j] = c[j] (the non-trainable parameter).
    c = jnp.arange(LOWER_LIMIT, UPPER_LIMIT, DELTA, dtype=jnp.float32)  # (K,)
    c_tiled = jnp.tile(c, P).reshape(1, KP)                             # (1, P*K)

    out = pl.pallas_call(
        partial(_fta_kernel, delta=DELTA, eta=ETA),
        out_shape=jax.ShapeDtypeStruct((rows_p, KP), out_dtype),
        grid_spec=pltpu.PrefetchScalarGridSpec(
            num_scalar_prefetch=0,
            grid=grid,
            in_specs=[
                pl.BlockSpec((tm, P), lambda i: (i, 0)),      # packed input rows
                pl.BlockSpec((3 * P, KP), lambda i: (0, 0)),  # expansion matrix, resident
                pl.BlockSpec((1, KP), lambda i: (0, 0)),      # tiled centers, resident
            ],
            out_specs=pl.BlockSpec((tm, KP), lambda i: (i, 0)),
        ),
        compiler_params=pltpu.CompilerParams(
            dimension_semantics=("parallel",),
            vmem_limit_bytes=48 * 1024 * 1024,
        ),
    )(z2, e3, c_tiled)

    # Row-major flat of (rows_p, P*K) is padded out_flat[f*K + j]; drop padding
    # and restore the leading shape (matches torch's view(..., 1) -> view(..., -1)).
    return out.reshape(-1)[: R * K].reshape(*orig_shape[:-1], D * K)


def fta_reference(z):
    """Pure-JAX reference mirroring the PyTorch forward."""
    c = jnp.arange(LOWER_LIMIT, UPPER_LIMIT, DELTA, dtype=jnp.float32)
    zz = z.astype(jnp.float32)[..., None]                               # (..., D, 1)
    u = jnp.maximum(c - zz, 0.0) + jnp.maximum(zz - DELTA - c, 0.0)
    fuzzy = jnp.where(u <= ETA, u, 0.0) + (u > ETA).astype(jnp.float32)
    out = 1.0 - fuzzy
    return out.reshape(*z.shape[:-1], z.shape[-1] * K)


if __name__ == "__main__":
    key = jax.random.PRNGKey(0)
    k1, k2 = jax.random.split(key)

    # Small shape consistent with the module's element-wise expansion:
    # (batch=2, channels=4, hidden=16) -> (2, 4, 16*20)
    z_small = jax.random.normal(k1, (2, 4, 16), dtype=jnp.float32) * 10.0
    out_small = jax.block_until_ready(fta(z_small))
    ref_small = fta_reference(z_small)
    assert out_small.shape == (2, 4, 16 * K), out_small.shape
    assert jnp.allclose(out_small, ref_small, atol=1e-5, rtol=1e-5), \
        float(jnp.max(jnp.abs(out_small - ref_small)))

    # Medium shape that exercises the real tiled path (tm=256, grid=(4,)),
    # addressing the "production configuration untested" review concern.
    z_med = jax.random.normal(k2, (16, 64, 128), dtype=jnp.float32) * 10.0
    out_med = jax.block_until_ready(fta(z_med))
    ref_med = fta_reference(z_med)
    assert out_med.shape == (16, 64, 128 * K), out_med.shape
    assert jnp.allclose(out_med, ref_med, atol=1e-5, rtol=1e-5), \
        float(jnp.max(jnp.abs(out_med - ref_med)))

    print("KERNEL_OK")
</pallas_src>

<mosaic_0001>
module attributes {stable_mosaic.version = 11 : i64} {
  func.func @_fta_kernel(%arg0: i32, %arg1: memref<8x128xf32, #tpu.memory_space<vmem>>, %arg2: memref<384x2560xbf16, #tpu.memory_space<vmem>>, %arg3: memref<1x2560xf32, #tpu.memory_space<vmem>>, %arg4: memref<8x2560xf32, #tpu.memory_space<vmem>>) attributes {dimension_semantics = [#tpu.dimension_semantics<parallel>], iteration_bounds = array<i64: 1>, scalar_prefetch = 0 : i64, scratch_operands = 0 : i64, tpu.core_type = #tpu.core_type<tc>, window_params = [{transform_indices = @transform_0, window_bounds = array<i64: 8, 128>}, {pipeline_mode = #tpu.pipeline_mode<synchronous>, transform_indices = @transform_1, window_bounds = array<i64: 384, 2560>}, {pipeline_mode = #tpu.pipeline_mode<synchronous>, transform_indices = @transform_2, window_bounds = array<i64: 1, 2560>}, {transform_indices = @transform_3, window_bounds = array<i64: 8, 2560>}]} {
    %c0 = arith.constant 0 : index
    %c0_0 = arith.constant 0 : index
    %0 = vector.load %arg1[%c0, %c0_0] : memref<8x128xf32, #tpu.memory_space<vmem>>, vector<8x128xf32>
    %1 = arith.truncf %0 : vector<8x128xf32> to vector<8x128xbf16>
    %2 = arith.extf %1 : vector<8x128xbf16> to vector<8x128xf32>
    %3 = arith.subf %0, %2 : vector<8x128xf32>
    %4 = arith.truncf %3 : vector<8x128xf32> to vector<8x128xbf16>
    %5 = arith.extf %4 : vector<8x128xbf16> to vector<8x128xf32>
    %6 = arith.subf %3, %5 : vector<8x128xf32>
    %7 = arith.truncf %6 : vector<8x128xf32> to vector<8x128xbf16>
    %8 = tpu.concatenate %1, %4, %7 in 1 : vector<8x128xbf16>, vector<8x128xbf16>, vector<8x128xbf16> -> vector<8x384xbf16>
    %c0_1 = arith.constant 0 : index
    %c0_2 = arith.constant 0 : index
    %9 = vector.load %arg2[%c0_1, %c0_2] : memref<384x2560xbf16, #tpu.memory_space<vmem>>, vector<384x2560xbf16>
    %cst = arith.constant dense<0.000000e+00> : vector<8x2560xf32>
    %10 = tpu.matmul %8, %9, %cst {dimension_numbers = #tpu.dot_dimension_numbers<[1], [0], [0], [1], [0, 0, 1, 1], [], []>} : vector<8x384xbf16>, vector<384x2560xbf16>, vector<8x2560xf32> -> vector<8x2560xf32>
    %c0_3 = arith.constant 0 : index
    %c0_4 = arith.constant 0 : index
    %11 = vector.load %arg3[%c0_3, %c0_4] : memref<1x2560xf32, #tpu.memory_space<vmem>>, vector<1x2560xf32>
    %12 = vector.broadcast %11 : vector<1x2560xf32> to vector<8x2560xf32>
    %13 = arith.subf %12, %10 : vector<8x2560xf32>
    %cst_5 = arith.constant 2.000000e+00 : f32
    %14 = vector.broadcast %cst_5 : f32 to vector<8x2560xf32>
    %15 = arith.subf %10, %14 : vector<8x2560xf32>
    %16 = vector.broadcast %11 : vector<1x2560xf32> to vector<8x2560xf32>
    %17 = arith.subf %15, %16 : vector<8x2560xf32>
    %18 = arith.maximumf %13, %17 : vector<8x2560xf32>
    %cst_6 = arith.constant 0.000000e+00 : f32
    %19 = vector.broadcast %cst_6 : f32 to vector<8x2560xf32>
    %20 = arith.maximumf %18, %19 : vector<8x2560xf32>
    %cst_7 = arith.constant 2.000000e+00 : f32
    %21 = vector.broadcast %cst_7 : f32 to vector<8x2560xf32>
    %22 = arith.cmpf ole, %20, %21 : vector<8x2560xf32>
    %cst_8 = arith.constant 1.000000e+00 : f32
    %23 = vector.broadcast %cst_8 : f32 to vector<8x2560xf32>
    %24 = arith.subf %23, %20 : vector<8x2560xf32>
    %cst_9 = arith.constant 0.000000e+00 : f32
    %25 = vector.broadcast %cst_9 : f32 to vector<8x2560xf32>
    %26 = arith.select %22, %24, %25 : vector<8x2560xi1>, vector<8x2560xf32>
    %c0_10 = arith.constant 0 : index
    %c0_11 = arith.constant 0 : index
    %27 = vector.load %arg4[%c0_10, %c0_11] : memref<8x2560xf32, #tpu.memory_space<vmem>>, vector<8x2560xf32>
    tpu.vector_store %arg4[%c0_10, %c0_11], %26 {strides = array<i32>} : memref<8x2560xf32, #tpu.memory_space<vmem>>, vector<8x2560xf32>,
    return
  }
  func.func @transform_0(%arg0: i32) -> (i32, i32) {
    %c0_i32 = arith.constant 0 : i32
    %c0_i32_0 = arith.constant 0 : i32
    return %arg0, %c0_i32 : i32, i32
  }
  func.func @transform_1(%arg0: i32) -> (i32, i32) {
    %c0_i32 = arith.constant 0 : i32
    %c0_i32_0 = arith.constant 0 : i32
    %c0_i32_1 = arith.constant 0 : i32
    return %c0_i32, %c0_i32_0 : i32, i32
  }
  func.func @transform_2(%arg0: i32) -> (i32, i32) {
    %c0_i32 = arith.constant 0 : i32
    %c0_i32_0 = arith.constant 0 : i32
    %c0_i32_1 = arith.constant 0 : i32
    return %c0_i32, %c0_i32_0 : i32, i32
  }
  func.func @transform_3(%arg0: i32) -> (i32, i32) {
    %c0_i32 = arith.constant 0 : i32
    %c0_i32_0 = arith.constant 0 : i32
    return %arg0, %c0_i32 : i32, i32
  }
}

</mosaic_0001>

<bundles_post_ra>
// kernel: tpu_custom_call.1
= control target key start
LH: loop header
LB: loop body
LE: loop exit
PB: predicated region body
PF: predicated region fallthrough
CT: control target
= control target key end

     0   :  { %8 = vsyncpa [#allocation3], 0  ;;  %s5656_s0 = inlined_call_operand.hbm [shape: f32[8,128], index: 0, kind: input, shape index: {}]   ;;  %s5657_s1 = inlined_call_operand.hbm [shape: bf16[384,2560], index: 1, kind: input, shape index: {}]   ;;  %s5658_s2 = inlined_call_operand.hbm [shape: f32[1,2560], index: 2, kind: input, shape index: {}]   ;;  %s5659_s3 = inlined_call_operand.hbm [shape: f32[8,2560], index: 3, kind: output, shape index: {}]  }
   0x1   :  { %9 = vsyncpa [#allocation6], 0 }
   0x2   :  { %10 = vsyncpa [#allocation4], 0  ;;  %s5424_s12 = smov [#allocation5]   ;;  %s5330_s16 = scalar_lea.hbm %s5657_s1, 61440 }
   0x3   :  { %s26_s13 = sshll.u32 %s5424_s12, 4  ;;  %p5331_p0 = scmp.ne.s32.totalorder %s5657_s1, %s5330_s16  ;;  %s27_s13 = int_to_ptr.vmem [resolvable:$true] %s26_s13 }
   0x4   :  { %p5334_p1 = scmp.lt.u32.totalorder %s5330_s16, %s5657_s1 }
   0x6   :  { %p5336_p2 = pnand %p5334_p1, %p5331_p0 }
   0x8   :  { %5339 = shalt.err (!%p5336_p2)
}
   0x9   :  { %s5340_s21 = scalar_lea.vmem %s27_s13, 61440  ;;  %p5345_p4 = scmp.lt.s32.totalorder %s27_s13, %s27_s13 }
   0xa   :  { %p5341_p3 = scmp.ne.s32.totalorder %s27_s13, %s5340_s21  ;;  %p5346_p5 = scmp.lt.s32.totalorder %s5340_s21, %s5340_s21 }
   0xc   :  { %p5347_p6 = por %p5346_p5, %p5345_p4 }
   0xe   :  { %p5348_p7 = pnand %p5347_p6, %p5341_p3 }
  0x10   :  { %5351 = shalt.err (!%p5348_p7)
}
  0x11   :  { %s5425_s22 = smov 1280   ;;  %s5426_s23 = smov 80  }
  0x12   :  { %32 = dma.hbm_to_vmem [thread:$0]  %s5657_s1, 61440, %s27_s13, [#allocation6], %s5425_s22, %s5425_s22, %s5426_s23  }
  0x13   :  { %s5427_s26 = smov [#allocation2]   ;;  %s5428_s28 = smov [#allocation7]  }
  0x14   :  { %s17_s27 = sshll.u32 %s5427_s26, 4  ;;  %s39_s29 = sshll.u32 %s5428_s28, 4  ;;  %s18_s27 = int_to_ptr.vmem [resolvable:$true] %s17_s27  ;;  %s40_s29 = int_to_ptr.vmem [resolvable:$true] %s39_s29 }
  0x15   :  { %s5352_s5 = scalar_lea.hbm %s5656_s0, 128 }
  0x16   :  { %p5353_p8 = scmp.ne.s32.totalorder %s5656_s0, %s5352_s5  ;;  %p5356_p9 = scmp.lt.u32.totalorder %s5352_s5, %s5656_s0 }
  0x18   :  { %p5358_p10 = pnand %p5356_p9, %p5353_p8 }
  0x1a   :  { %5361 = shalt.err (!%p5358_p10)
}
  0x1b   :  { %s5362_s1 = scalar_lea.vmem %s18_s27, 128  ;;  %p5367_p12 = scmp.lt.s32.totalorder %s18_s27, %s18_s27 }
  0x1c   :  { %p5363_p11 = scmp.ne.s32.totalorder %s18_s27, %s5362_s1  ;;  %p5368_p13 = scmp.lt.s32.totalorder %s5362_s1, %s5362_s1 }
  0x1e   :  { %p5369_p0 = por %p5368_p13, %p5367_p12 }
  0x20   :  { %p5370_p1 = pnand %p5369_p0, %p5363_p11 }
  0x22   :  { %5373 = shalt.err (!%p5370_p1)
}
  0x23   :  { %20 = dma.hbm_to_vmem [thread:$0]  %s5656_s0, 128, %s18_s27, [#allocation3]  }
  0x24   :  { %s5374_s14 = scalar_lea.hbm %s5658_s2, 320 }
  0x25   :  { %p5375_p2 = scmp.ne.s32.totalorder %s5658_s2, %s5374_s14  ;;  %p5378_p3 = scmp.lt.u32.totalorder %s5374_s14, %s5658_s2 }
  0x27   :  { %p5380_p4 = pnand %p5378_p3, %p5375_p2 }
  0x29   :  { %5383 = shalt.err (!%p5380_p4)
}
  0x2a   :  { %s5384_s19 = scalar_lea.vmem %s40_s29, 320  ;;  %p5389_p6 = scmp.lt.s32.totalorder %s40_s29, %s40_s29 }
  0x2b   :  { %p5385_p5 = scmp.ne.s32.totalorder %s40_s29, %s5384_s19  ;;  %p5390_p7 = scmp.lt.s32.totalorder %s5384_s19, %s5384_s19 }
  0x2d   :  { %p5391_p8 = por %p5390_p7, %p5389_p6 }
  0x2f   :  { %p5392_p9 = pnand %p5391_p8, %p5385_p5 }
  0x31   :  { %5395 = shalt.err (!%p5392_p9)
}
  0x32   :  { %42 = dma.hbm_to_vmem [thread:$0]  %s5658_s2, 320, %s40_s29, [#allocation6]  }
  0x33   :  { %5418 = dma.done.wait [#allocation3], 128  }
  0x34   :  { %5419 = vsyncadd [#allocation3], 4294967168 }
  0x35   :  { %5420 = dma.done.wait [#allocation6], 61760  }
  0x36   :  { %5421 = vsyncadd [#allocation6], 4294905536  ;;  %v4610_v0 = vld [vmem:[#allocation5 + $0x4] ss:$80 sps:$4 sm:$0xff]   ;;  %v4612_v1 = vld [vmem:[#allocation5 + $0xc] ss:$80 sps:$4 sm:$0xff]  }
  0x37   :  { %2941 = vmatprep.subr.bf16.mxu0 %v4610_v0  ;;  %v4614_v2 = vld [vmem:[#allocation5] ss:$80 sps:$4 sm:$0xff]   ;;  %v4615_v3 = vld [vmem:[#allocation5 + $0x8] ss:$80 sps:$4 sm:$0xff]   ;;  %3023 = vmatprep.subr.bf16.mxu1 %v4612_v1  ;;  %v4616_v4 = vld [vmem:[#allocation5 + $0xa4] ss:$80 sps:$4 sm:$0xff]  }
  0x38   :  { %2942 = vmatpush1.bf16.msra.mxu0 %v4614_v2  ;;  %3024 = vmatpush1.bf16.msra.mxu1 %v4615_v3  ;;  %v4618_v5 = vld [vmem:[#allocation5 + $0xac] ss:$80 sps:$4 sm:$0xff]   ;;  %v4620_v6 = vld [vmem:[#allocation5 + $0xa0] ss:$80 sps:$4 sm:$0xff]   ;;  %v4621_v7 = vld [vmem:[#allocation5 + $0xa8] ss:$80 sps:$4 sm:$0xff]  }
  0x39   :  { %2943 = vmatprep.subr.bf16.mxu0 %v4616_v4  ;;  %3025 = vmatprep.subr.bf16.mxu1 %v4618_v5  ;;  %v4622_v8 = vld [vmem:[#allocation5 + $0x144] ss:$80 sps:$4 sm:$0xff]   ;;  %v4624_v9 = vld [vmem:[#allocation5 + $0x14c] ss:$80 sps:$4 sm:$0xff]   ;;  %v4626_v10 = vld [vmem:[#allocation5 + $0x140] ss:$80 sps:$4 sm:$0xff]  }
  0x3a   :  { %v4627_v11 = vld [vmem:[#allocation5 + $0x148] ss:$80 sps:$4 sm:$0xff]   ;;  %v4628_v12 = vld [vmem:[#allocation5 + $0x1e4] ss:$80 sps:$4 sm:$0xff]   ;;  %v4630_v13 = vld [vmem:[#allocation5 + $0x1ec] ss:$80 sps:$4 sm:$0xff]  }
  0x3b   :  { %v4632_v14 = vld [vmem:[#allocation5 + $0x1e0] ss:$80 sps:$4 sm:$0xff]   ;;  %v4633_v15 = vld [vmem:[#allocation5 + $0x1e8] ss:$80 sps:$4 sm:$0xff]   ;;  %v4634_v16 = vld [vmem:[#allocation5 + $0x284] ss:$80 sps:$4 sm:$0xff]  }
  0x3c   :  { %2944 = vmatpush1.bf16.msra.mxu0 %v4620_v6  ;;  %3026 = vmatpush1.bf16.msra.mxu1 %v4621_v7  ;;  %v4636_v17 = vld [vmem:[#allocation5 + $0x28c] ss:$80 sps:$4 sm:$0xff]   ;;  %v4638_v18 = vld [vmem:[#allocation5 + $0x280] ss:$80 sps:$4 sm:$0xff]   ;;  %v4639_v19 = vld [vmem:[#allocation5 + $0x288] ss:$80 sps:$4 sm:$0xff]  }
  0x3d   :  { %2945 = vmatprep.subr.bf16.mxu0 %v4622_v8  ;;  %3027 = vmatprep.subr.bf16.mxu1 %v4624_v9  ;;  %v4640_v20 = vld [vmem:[#allocation5 + $0x324] ss:$80 sps:$4 sm:$0xff]   ;;  %v4642_v21 = vld [vmem:[#allocation5 + $0x32c] ss:$80 sps:$4 sm:$0xff]   ;;  %v4644_v22 = vld [vmem:[#allocation5 + $0x320] ss:$80 sps:$4 sm:$0xff]  }
  0x3e   :  { %v4645_v23 = vld [vmem:[#allocation5 + $0x328] ss:$80 sps:$4 sm:$0xff]   ;;  %v4646_v24 = vld [vmem:[#allocation5 + $0x3c4] ss:$80 sps:$4 sm:$0xff]   ;;  %v4648_v25 = vld [vmem:[#allocation5 + $0x3cc] ss:$80 sps:$4 sm:$0xff]  }
  0x3f   :  { %v4650_v26 = vld [vmem:[#allocation5 + $0x3c0] ss:$80 sps:$4 sm:$0xff]   ;;  %v4651_v27 = vld [vmem:[#allocation5 + $0x3c8] ss:$80 sps:$4 sm:$0xff]   ;;  %v4652_v28 = vld [vmem:[#allocation5 + $0x464] ss:$80 sps:$4 sm:$0xff]  }
  0x40   :  { %2946 = vmatpush1.bf16.msra.mxu0 %v4626_v10  ;;  %3028 = vmatpush1.bf16.msra.mxu1 %v4627_v11  ;;  %v4654_v29 = vld [vmem:[#allocation5 + $0x46c] ss:$80 sps:$4 sm:$0xff]   ;;  %v4656_v30 = vld [vmem:[#allocation5 + $0x460] ss:$80 sps:$4 sm:$0xff]   ;;  %v4657_v31 = vld [vmem:[#allocation5 + $0x468] ss:$80 sps:$4 sm:$0xff]  }
  0x41   :  { %2947 = vmatprep.subr.bf16.mxu0 %v4628_v12  ;;  %3029 = vmatprep.subr.bf16.mxu1 %v4630_v13  ;;  %v4658_v32 = vld [vmem:[#allocation5 + $0x504] ss:$80 sps:$4 sm:$0xff]   ;;  %v4660_v33 = vld [vmem:[#allocation5 + $0x50c] ss:$80 sps:$4 sm:$0xff]   ;;  %v4662_v34 = vld [vmem:[#allocation5 + $0x500] ss:$80 sps:$4 sm:$0xff]  }
  0x42   :  { %v4663_v35 = vld [vmem:[#allocation5 + $0x508] ss:$80 sps:$4 sm:$0xff]   ;;  %v4664_v36 = vld [vmem:[#allocation5 + $0x5a4] ss:$80 sps:$4 sm:$0xff]   ;;  %v4666_v37 = vld [vmem:[#allocation5 + $0x5ac] ss:$80 sps:$4 sm:$0xff]  }
  0x43   :  { %v4668_v38 = vld [vmem:[#allocation5 + $0x5a0] ss:$80 sps:$4 sm:$0xff]   ;;  %v4669_v39 = vld [vmem:[#allocation5 + $0x5a8] ss:$80 sps:$4 sm:$0xff]   ;;  %v4670_v40 = vld [vmem:[#allocation5 + $0x644] ss:$80 sps:$4 sm:$0xff]  }
  0x44   :  { %2948 = vmatpush1.bf16.msra.mxu0 %v4632_v14  ;;  %3030 = vmatpush1.bf16.msra.mxu1 %v4633_v15  ;;  %v4672_v41 = vld [vmem:[#allocation5 + $0x64c] ss:$80 sps:$4 sm:$0xff]   ;;  %v4674_v42 = vld [vmem:[#allocation5 + $0x640] ss:$80 sps:$4 sm:$0xff]   ;;  %v4675_v43 = vld [vmem:[#allocation5 + $0x648] ss:$80 sps:$4 sm:$0xff]  }
  0x45   :  { %2949 = vmatprep.subr.bf16.mxu0 %v4634_v16  ;;  %3031 = vmatprep.subr.bf16.mxu1 %v4636_v17  ;;  %v4676_v44 = vld [vmem:[#allocation5 + $0x6e4] ss:$80 sps:$4 sm:$0xff]   ;;  %v4678_v45 = vld [vmem:[#allocation5 + $0x6ec] ss:$80 sps:$4 sm:$0xff]   ;;  %v4680_v47 = vld [vmem:[#allocation5 + $0x6e0] ss:$80 sps:$4 sm:$0xff]  }
  0x46   :  { %v53_v46 = vld [vmem:[#allocation2] sm:$0xff]  ;;  %v4682_v50 = vld [vmem:[#allocation5 + $0x784] ss:$80 sps:$4 sm:$0xff]   ;;  %v4686_v53 = vld [vmem:[#allocation5 + $0x780] ss:$80 sps:$4 sm:$0xff]   ;;  %v5429_v15 = vmov 0  }
  0x47   :  { %v5487_v48 = vpack.c.bf16 %v53_v46, %v53_v46  ;;  %v4681_v49 = vld [vmem:[#allocation5 + $0x6e8] ss:$80 sps:$4 sm:$0xff]   ;;  %v4684_v51 = vld [vmem:[#allocation5 + $0x78c] ss:$80 sps:$4 sm:$0xff]   ;;  %v4688_v56 = vld [vmem:[#allocation5 + $0x824] ss:$80 sps:$4 sm:$0xff]  }
  0x48   :  { %2950 = vmatpush1.bf16.msra.mxu0 %v4638_v18  ;;  %3032 = vmatpush1.bf16.msra.mxu1 %v4639_v19  ;;  %v4687_v55 = vld [vmem:[#allocation5 + $0x788] ss:$80 sps:$4 sm:$0xff]   ;;  %v4690_v57 = vld [vmem:[#allocation5 + $0x82c] ss:$80 sps:$4 sm:$0xff]   ;;  %v4692_v59 = vld [vmem:[#allocation5 + $0x820] ss:$80 sps:$4 sm:$0xff]  }
  0x49   :  { %2951 = vmatprep.subr.bf16.mxu0 %v4640_v20  ;;  %3033 = vmatprep.subr.bf16.mxu1 %v4642_v21  ;;  %v55_v52 = vunpack.c.l.bf16 %v5487_v48  ;;  %v4693_v60 = vld [vmem:[#allocation5 + $0x828] ss:$80 sps:$4 sm:$0xff]   ;;  %v4694_v61 = vld [vmem:[#allocation5 + $0x8c4] ss:$80 sps:$4 sm:$0xff]   ;;  %v4696_v62 = vld [vmem:[#allocation5 + $0x8cc] ss:$80 sps:$4 sm:$0xff]  }
  0x4a   :  { %v4698_v63 = vld [vmem:[#allocation5 + $0x8c0] ss:$80 sps:$4 sm:$0xff]   ;;  %v4699_v0 = vld [vmem:[#allocation5 + $0x8c8] ss:$80 sps:$4 sm:$0xff]   ;;  %v4700_v1 = vld [vmem:[#allocation5 + $0x964] ss:$80 sps:$4 sm:$0xff]  }
  0x4b   :  { %v5490_v54 = vsub.f32 %v53_v46, %v55_v52  ;;  %v4702_v2 = vld [vmem:[#allocation5 + $0x96c] ss:$80 sps:$4 sm:$0xff]   ;;  %v4704_v3 = vld [vmem:[#allocation5 + $0x960] ss:$80 sps:$4 sm:$0xff]   ;;  %v4705_v4 = vld [vmem:[#allocation5 + $0x968] ss:$80 sps:$4 sm:$0xff]  }
  0x4c   :  { %2952 = vmatpush1.bf16.msra.mxu0 %v4644_v22  ;;  %3034 = vmatpush1.bf16.msra.mxu1 %v4645_v23  ;;  %v4708_v5 = vld [vmem:[#allocation5 + $0xa04] ss:$80 sps:$4 sm:$0xff]   ;;  %v4711_v6 = vld [vmem:[#allocation5 + $0xa0c] ss:$80 sps:$4 sm:$0xff]   ;;  %v4706_v7 = vld [vmem:[#allocation5 + $0xa00] ss:$80 sps:$4 sm:$0xff]  }
  0x4d   :  { %2953 = vmatprep.subr.bf16.mxu0 %v4646_v24  ;;  %3035 = vmatprep.subr.bf16.mxu1 %v4648_v25  ;;  %v5494_v58 = vpack.c.bf16 %v5490_v54, %v5490_v54  ;;  %v4709_v8 = vld [vmem:[#allocation5 + $0xa08] ss:$80 sps:$4 sm:$0xff]   ;;  %v4714_v9 = vld [vmem:[#allocation5 + $0xaa4] ss:$80 sps:$4 sm:$0xff]   ;;  %v4717_v10 = vld [vmem:[#allocation5 + $0xaac] ss:$80 sps:$4 sm:$0xff]  }
  0x4e   :  { %v4712_v11 = vld [vmem:[#allocation5 + $0xaa0] ss:$80 sps:$4 sm:$0xff]   ;;  %v4715_v12 = vld [vmem:[#allocation5 + $0xaa8] ss:$80 sps:$4 sm:$0xff]   ;;  %v4720_v13 = vld [vmem:[#allocation5 + $0xb44] ss:$80 sps:$4 sm:$0xff]  }
  0x4f   :  { %2973 = vmatprep.mubr.bf16.mxu0 %v5494_v58  ;;  %3055 = vmatprep.mubr.bf16.mxu1 %v5494_v58  ;;  %v4723_v14 = vld [vmem:[#allocation5 + $0xb4c] ss:$80 sps:$4 sm:$0xff]   ;;  %v4718_v16 = vld [vmem:[#allocation5 + $0xb40] ss:$80 sps:$4 sm:$0xff]   ;;  %v4721_v17 = vld [vmem:[#allocation5 + $0xb48] ss:$80 sps:$4 sm:$0xff]  }
  0x50   :  { %2954 = vmatpush1.bf16.msra.mxu0 %v4650_v26  ;;  %3036 = vmatpush1.bf16.msra.mxu1 %v4651_v27  ;;  %v4726_v18 = vld [vmem:[#allocation5 + $0xbe4] ss:$80 sps:$4 sm:$0xff]   ;;  %v4729_v19 = vld [vmem:[#allocation5 + $0xbec] ss:$80 sps:$4 sm:$0xff]   ;;  %v4724_v20 = vld [vmem:[#allocation5 + $0xbe0] ss:$80 sps:$4 sm:$0xff]  }
  0x51   :  { %2955 = vmatprep.subr.bf16.mxu0 %v4652_v28  ;;  %3037 = vmatprep.subr.bf16.mxu1 %v4654_v29  ;;  %v4727_v21 = vld [vmem:[#allocation5 + $0xbe8] ss:$80 sps:$4 sm:$0xff]   ;;  %v4732_v22 = vld [vmem:[#allocation5 + $0xc84] ss:$80 sps:$4 sm:$0xff]   ;;  %v4735_v23 = vld [vmem:[#allocation5 + $0xc8c] ss:$80 sps:$4 sm:$0xff]  }
  0x52   :  { %v4730_v24 = vld [vmem:[#allocation5 + $0xc80] ss:$80 sps:$4 sm:$0xff]   ;;  %v4733_v25 = vld [vmem:[#allocation5 + $0xc88] ss:$80 sps:$4 sm:$0xff]   ;;  %v4738_v26 = vld [vmem:[#allocation5 + $0xd24] ss:$80 sps:$4 sm:$0xff]  }
  0x53   :  { %v4741_v27 = vld [vmem:[#allocation5 + $0xd2c] ss:$80 sps:$4 sm:$0xff]   ;;  %v4736_v28 = vld [vmem:[#allocation5 + $0xd20] ss:$80 sps:$4 sm:$0xff]   ;;  %v4739_v29 = vld [vmem:[#allocation5 + $0xd28] ss:$80 sps:$4 sm:$0xff]  }
  0x54   :  { %2956 = vmatpush1.bf16.msra.mxu0 %v4656_v30  ;;  %3038 = vmatpush1.bf16.msra.mxu1 %v4657_v31  ;;  %v4744_v30 = vld [vmem:[#allocation5 + $0xdc4] ss:$80 sps:$4 sm:$0xff]   ;;  %v4747_v31 = vld [vmem:[#allocation5 + $0xdcc] ss:$80 sps:$4 sm:$0xff]   ;;  %v4766_v52 = vld [vmem:[#allocation5 + $0x150] ss:$80 sps:$4 sm:$0xff]  }
  0x55   :  { %2957 = vmatprep.subr.bf16.mxu0 %v4658_v32  ;;  %3039 = vmatprep.subr.bf16.mxu1 %v4660_v33  ;;  %v4742_v32 = vld [vmem:[#allocation5 + $0xdc0] ss:$80 sps:$4 sm:$0xff]   ;;  %v58_v33 = vunpack.c.l.bf16 %v5494_v58  ;;  %v4765_v46 = vld [vmem:[#allocation5 + $0xbc] ss:$80 sps:$4 sm:$0xff]   ;;  %s5430_s2 = smov [#allocation8]  }
  0x56   :  { %s4053_s21 = sshll.u32 %s5430_s2, 4  ;;  %s4054_s21 = int_to_ptr.vmem [resolvable:$true] %s4053_s21 }
  0x57   :  { %s5396_s22 = scalar_lea.vmem %s4054_s21, 2560  ;;  %p5401_p11 = scmp.lt.s32.totalorder %s4054_s21, %s4054_s21 }
  0x58   :  { %2958 = vmatpush1.bf16.msra.mxu0 %v4662_v34  ;;  %3040 = vmatpush1.bf16.msra.mxu1 %v4663_v35  ;;  %v4745_v34 = vld [vmem:[#allocation5 + $0xdc8] ss:$80 sps:$4 sm:$0xff]   ;;  %v4750_v35 = vld [vmem:[#allocation5 + $0xe64] ss:$80 sps:$4 sm:$0xff]   ;;  %p5397_p10 = scmp.ne.s32.totalorder %s4054_s21, %s5396_s22  ;;  %p5402_p12 = scmp.lt.s32.totalorder %s5396_s22, %s5396_s22 }
  0x59   :  { %2959 = vmatprep.subr.bf16.mxu0 %v4664_v36  ;;  %3041 = vmatprep.subr.bf16.mxu1 %v4666_v37  ;;  %v4753_v36 = vld [vmem:[#allocation5 + $0xe6c] ss:$80 sps:$4 sm:$0xff]   ;;  %v4748_v37 = vld [vmem:[#allocation5 + $0xe60] ss:$80 sps:$4 sm:$0xff]  }
  0x5a   :  { %p5403_p13 = por %p5402_p12, %p5401_p11 }
  0x5c   :  { %2960 = vmatpush1.bf16.msra.mxu0 %v4668_v38  ;;  %3042 = vmatpush1.bf16.msra.mxu1 %v4669_v39  ;;  %v59_v38 = vsub.f32 %v5490_v54, %v58_v33  ;;  %v4751_v39 = vld [vmem:[#allocation5 + $0xe68] ss:$80 sps:$4 sm:$0xff]   ;;  %v4774_v54 = vld [vmem:[#allocation5 + $0x1f4] ss:$80 sps:$4 sm:$0xff]   ;;  %v4837_v33 = vld [vmem:[#allocation5 + $0x83c] ss:$80 sps:$4 sm:$0xff]   ;;  %p5404_p0 = pnand %p5403_p13, %p5397_p10 }
  0x5d   :  { %2961 = vmatprep.subr.bf16.mxu0 %v4670_v40  ;;  %3043 = vmatprep.subr.bf16.mxu1 %v4672_v41  ;;  %v4756_v40 = vld [vmem:[#allocation5 + $0x14] ss:$80 sps:$4 sm:$0xff]   ;;  %v4759_v41 = vld [vmem:[#allocation5 + $0x1c] ss:$80 sps:$4 sm:$0xff]  }
  0x60   :  { %2962 = vmatpush1.bf16.msra.mxu0 %v4674_v42  ;;  %3044 = vmatpush1.bf16.msra.mxu1 %v4675_v43  ;;  %v5504_v42 = vpack.c.bf16 %v59_v38, %v59_v38  ;;  %v4754_v43 = vld [vmem:[#allocation5 + $0x10] ss:$80 sps:$4 sm:$0xff]  }
  0x61   :  { %2963 = vmatprep.subr.bf16.mxu0 %v4676_v44  ;;  %3045 = vmatprep.subr.bf16.mxu1 %v4678_v45  ;;  %v4757_v44 = vld [vmem:[#allocation5 + $0x18] ss:$80 sps:$4 sm:$0xff]   ;;  %v4762_v45 = vld [vmem:[#allocation5 + $0xb4] ss:$80 sps:$4 sm:$0xff]   ;;  %v4838_v38 = vld [vmem:[#allocation5 + $0x8d0] ss:$80 sps:$4 sm:$0xff]  }
  0x64   :  { %2964 = vmatpush1.bf16.msra.mxu0 %v4680_v47  ;;  %3046 = vmatpush1.bf16.msra.mxu1 %v4681_v49  ;;  %v4760_v47 = vld [vmem:[#allocation5 + $0xb0] ss:$80 sps:$4 sm:$0xff]   ;;  %v4763_v49 = vld [vmem:[#allocation5 + $0xb8] ss:$80 sps:$4 sm:$0xff]  }
  0x65   :  { %2965 = vmatprep.subr.bf16.mxu0 %v4682_v50  ;;  %3047 = vmatprep.subr.bf16.mxu1 %v4684_v51  ;;  %v4768_v50 = vld [vmem:[#allocation5 + $0x154] ss:$80 sps:$4 sm:$0xff]   ;;  %v4771_v51 = vld [vmem:[#allocation5 + $0x15c] ss:$80 sps:$4 sm:$0xff]  }
  0x68   :  { %2966 = vmatpush1.bf16.msra.mxu0 %v4686_v53  ;;  %3048 = vmatpush1.bf16.msra.mxu1 %v4687_v55  ;;  %v4769_v53 = vld [vmem:[#allocation5 + $0x158] ss:$80 sps:$4 sm:$0xff]   ;;  %v4777_v55 = vld [vmem:[#allocation5 + $0x1fc] ss:$80 sps:$4 sm:$0xff]  }
  0x69   :  { %2967 = vmatprep.subr.bf16.mxu0 %v4688_v56  ;;  %3049 = vmatprep.subr.bf16.mxu1 %v4690_v57  ;;  %v4772_v56 = vld [vmem:[#allocation5 + $0x1f0] ss:$80 sps:$4 sm:$0xff]   ;;  %v4775_v57 = vld [vmem:[#allocation5 + $0x1f8] ss:$80 sps:$4 sm:$0xff]  }
  0x6c   :  { %2968 = vmatpush1.bf16.msra.mxu0 %v4692_v59  ;;  %3050 = vmatpush1.bf16.msra.mxu1 %v4693_v60  ;;  %v4780_v59 = vld [vmem:[#allocation5 + $0x294] ss:$80 sps:$4 sm:$0xff]   ;;  %v4783_v60 = vld [vmem:[#allocation5 + $0x29c] ss:$80 sps:$4 sm:$0xff]  }
  0x6d   :  { %2969 = vmatprep.subr.bf16.mxu0 %v4694_v61  ;;  %3051 = vmatprep.subr.bf16.mxu1 %v4696_v62  ;;  %v4778_v61 = vld [vmem:[#allocation5 + $0x290] ss:$80 sps:$4 sm:$0xff]   ;;  %v4781_v62 = vld [vmem:[#allocation5 + $0x298] ss:$80 sps:$4 sm:$0xff]  }
  0x70   :  { %2970 = vmatpush1.bf16.msra.mxu0 %v4698_v63  ;;  %3052 = vmatpush1.bf16.msra.mxu1 %v4699_v0  ;;  %v4786_v63 = vld [vmem:[#allocation5 + $0x334] ss:$80 sps:$4 sm:$0xff]   ;;  %v4789_v0 = vld [vmem:[#allocation5 + $0x33c] ss:$80 sps:$4 sm:$0xff]  }
  0x71   :  { %2971 = vmatprep.subr.bf16.mxu0 %v4700_v1  ;;  %3053 = vmatprep.subr.bf16.mxu1 %v4702_v2  ;;  %v4784_v1 = vld [vmem:[#allocation5 + $0x330] ss:$80 sps:$4 sm:$0xff]   ;;  %v4787_v2 = vld [vmem:[#allocation5 + $0x338] ss:$80 sps:$4 sm:$0xff]  }
  0x74   :  { %2972 = vmatpush1.bf16.msra.mxu0 %v4704_v3  ;;  %3054 = vmatpush1.bf16.msra.mxu1 %v4705_v4  ;;  %v4792_v3 = vld [vmem:[#allocation5 + $0x3d4] ss:$80 sps:$4 sm:$0xff]   ;;  %v4795_v4 = vld [vmem:[#allocation5 + $0x3dc] ss:$80 sps:$4 sm:$0xff]  }
  0x75   :  { %2982 = vmatprep.subr.bf16.mxu0 %v4708_v5  ;;  %3064 = vmatprep.subr.bf16.mxu1 %v4711_v6  ;;  %v4790_v5 = vld [vmem:[#allocation5 + $0x3d0] ss:$80 sps:$4 sm:$0xff]   ;;  %v4793_v6 = vld [vmem:[#allocation5 + $0x3d8] ss:$80 sps:$4 sm:$0xff]  }
  0x77   :  { %2974 = vmatmul.mubr.bf16.vlgmr.msra.gmra.mrb[0].mxu0 %v5487_v48  ;;  %3056 = vmatmul.mubr.bf16.vlgmr.msra.gmra.mrb[0].mxu1 %v5487_v48 }
  0x78   :  { %2983 = vmatpush1.bf16.msra.mxu0 %v4706_v7  ;;  %3065 = vmatpush1.bf16.msra.mxu1 %v4709_v8  ;;  %v4798_v7 = vld [vmem:[#allocation5 + $0x474] ss:$80 sps:$4 sm:$0xff]   ;;  %v4801_v8 = vld [vmem:[#allocation5 + $0x47c] ss:$80 sps:$4 sm:$0xff]  }
  0x79   :  { %2984 = vmatprep.subr.bf16.mxu0 %v4714_v9  ;;  %3066 = vmatprep.subr.bf16.mxu1 %v4717_v10  ;;  %v4796_v9 = vld [vmem:[#allocation5 + $0x470] ss:$80 sps:$4 sm:$0xff]   ;;  %v4799_v10 = vld [vmem:[#allocation5 + $0x478] ss:$80 sps:$4 sm:$0xff]  }
  0x7a   :  { %3014 = vmatprep.mubr.bf16.mxu0 %v5429_v15  ;;  %3096 = vmatprep.mubr.bf16.mxu1 %v5429_v15 }
  0x7c   :  { %2985 = vmatpush1.bf16.msra.mxu0 %v4712_v11  ;;  %3067 = vmatpush1.bf16.msra.mxu1 %v4715_v12  ;;  %v4804_v11 = vld [vmem:[#allocation5 + $0x514] ss:$80 sps:$4 sm:$0xff]   ;;  %v4807_v12 = vld [vmem:[#allocation5 + $0x51c] ss:$80 sps:$4 sm:$0xff]  }
  0x7d   :  { %2986 = vmatprep.subr.bf16.mxu0 %v4720_v13  ;;  %3068 = vmatprep.subr.bf16.mxu1 %v4723_v14  ;;  %v4802_v13 = vld [vmem:[#allocation5 + $0x510] ss:$80 sps:$4 sm:$0xff]   ;;  %v4805_v14 = vld [vmem:[#allocation5 + $0x518] ss:$80 sps:$4 sm:$0xff]  }
  0x80   :  { %2987 = vmatpush1.bf16.msra.mxu0 %v4718_v16  ;;  %3069 = vmatpush1.bf16.msra.mxu1 %v4721_v17  ;;  %v4810_v16 = vld [vmem:[#allocation5 + $0x5b4] ss:$80 sps:$4 sm:$0xff]   ;;  %v4813_v17 = vld [vmem:[#allocation5 + $0x5bc] ss:$80 sps:$4 sm:$0xff]  }
  0x81   :  { %2988 = vmatprep.subr.bf16.mxu0 %v4726_v18  ;;  %3070 = vmatprep.subr.bf16.mxu1 %v4729_v19  ;;  %v4808_v18 = vld [vmem:[#allocation5 + $0x5b0] ss:$80 sps:$4 sm:$0xff]   ;;  %v4811_v19 = vld [vmem:[#allocation5 + $0x5b8] ss:$80 sps:$4 sm:$0xff]  }
  0x84   :  { %2989 = vmatpush1.bf16.msra.mxu0 %v4724_v20  ;;  %3071 = vmatpush1.bf16.msra.mxu1 %v4727_v21  ;;  %v4816_v20 = vld [vmem:[#allocation5 + $0x654] ss:$80 sps:$4 sm:$0xff]   ;;  %v4819_v21 = vld [vmem:[#allocation5 + $0x65c] ss:$80 sps:$4 sm:$0xff]  }
  0x85   :  { %2990 = vmatprep.subr.bf16.mxu0 %v4732_v22  ;;  %3072 = vmatprep.subr.bf16.mxu1 %v4735_v23  ;;  %v4814_v22 = vld [vmem:[#allocation5 + $0x650] ss:$80 sps:$4 sm:$0xff]   ;;  %v4817_v23 = vld [vmem:[#allocation5 + $0x658] ss:$80 sps:$4 sm:$0xff]  }
  0x88   :  { %2991 = vmatpush1.bf16.msra.mxu0 %v4730_v24  ;;  %3073 = vmatpush1.bf16.msra.mxu1 %v4733_v25  ;;  %v4822_v24 = vld [vmem:[#allocation5 + $0x6f4] ss:$80 sps:$4 sm:$0xff]   ;;  %v4825_v25 = vld [vmem:[#allocation5 + $0x6fc] ss:$80 sps:$4 sm:$0xff]  }
  0x89   :  { %2992 = vmatprep.subr.bf16.mxu0 %v4738_v26  ;;  %3074 = vmatprep.subr.bf16.mxu1 %v4741_v27  ;;  %v4820_v26 = vld [vmem:[#allocation5 + $0x6f0] ss:$80 sps:$4 sm:$0xff]   ;;  %v4823_v27 = vld [vmem:[#allocation5 + $0x6f8] ss:$80 sps:$4 sm:$0xff]  }
  0x8c   :  { %2993 = vmatpush1.bf16.msra.mxu0 %v4736_v28  ;;  %3075 = vmatpush1.bf16.msra.mxu1 %v4739_v29  ;;  %v4828_v28 = vld [vmem:[#allocation5 + $0x794] ss:$80 sps:$4 sm:$0xff]   ;;  %v4831_v29 = vld [vmem:[#allocation5 + $0x79c] ss:$80 sps:$4 sm:$0xff]  }
  0x8d   :  { %2994 = vmatprep.subr.bf16.mxu0 %v4744_v30  ;;  %3076 = vmatprep.subr.bf16.mxu1 %v4747_v31  ;;  %v4826_v30 = vld [vmem:[#allocation5 + $0x790] ss:$80 sps:$4 sm:$0xff]   ;;  %v4829_v31 = vld [vmem:[#allocation5 + $0x798] ss:$80 sps:$4 sm:$0xff]  }
  0x90   :  { %2995 = vmatpush1.bf16.msra.mxu0 %v4742_v32  ;;  %3077 = vmatpush1.bf16.msra.mxu1 %v4745_v34  ;;  %v4834_v32 = vld [vmem:[#allocation5 + $0x834] ss:$80 sps:$4 sm:$0xff]   ;;  %v4832_v34 = vld [vmem:[#allocation5 + $0x830] ss:$80 sps:$4 sm:$0xff]  }
  0x91   :  { %2996 = vmatprep.subr.bf16.mxu0 %v4750_v35  ;;  %3078 = vmatprep.subr.bf16.mxu1 %v4753_v36  ;;  %v4835_v35 = vld [vmem:[#allocation5 + $0x838] ss:$80 sps:$4 sm:$0xff]   ;;  %v4840_v36 = vld [vmem:[#allocation5 + $0x8d4] ss:$80 sps:$4 sm:$0xff]  }
  0x94   :  { %2997 = vmatpush1.bf16.msra.mxu0 %v4748_v37  ;;  %3079 = vmatpush1.bf16.msra.mxu1 %v4751_v39  ;;  %v4843_v37 = vld [vmem:[#allocation5 + $0x8dc] ss:$80 sps:$4 sm:$0xff]   ;;  %v4841_v39 = vld [vmem:[#allocation5 + $0x8d8] ss:$80 sps:$4 sm:$0xff]  }
  0x95   :  { %3105 = vmatprep.subr.bf16.mxu0 %v4756_v40  ;;  %3187 = vmatprep.subr.bf16.mxu1 %v4759_v41  ;;  %v4846_v40 = vld [vmem:[#allocation5 + $0x974] ss:$80 sps:$4 sm:$0xff]   ;;  %v4849_v41 = vld [vmem:[#allocation5 + $0x97c] ss:$80 sps:$4 sm:$0xff]  }
  0x97   :  { %3015 = vmatmul.mubr.bf16.vlgmr.msra.gmra.mrb[0].mxu0 %v5504_v42  ;;  %3097 = vmatmul.mubr.bf16.vlgmr.msra.gmra.mrb[0].mxu1 %v5504_v42 }
  0x98   :  { %3106 = vmatpush1.bf16.msra.mxu0 %v4754_v43  ;;  %3188 = vmatpush1.bf16.msra.mxu1 %v4757_v44  ;;  %v4844_v43 = vld [vmem:[#allocation5 + $0x970] ss:$80 sps:$4 sm:$0xff]   ;;  %v4847_v44 = vld [vmem:[#allocation5 + $0x978] ss:$80 sps:$4 sm:$0xff]  }
  0x99   :  { %3107 = vmatprep.subr.bf16.mxu0 %v4762_v45  ;;  %3189 = vmatprep.subr.bf16.mxu1 %v4765_v46  ;;  %v4852_v45 = vld [vmem:[#allocation5 + $0xa14] ss:$80 sps:$4 sm:$0xff]   ;;  %v4855_v46 = vld [vmem:[#allocation5 + $0xa1c] ss:$80 sps:$4 sm:$0xff]  }
  0x9a   :  { %3137 = vmatprep.mubr.bf16.mxu0 %v5494_v58  ;;  %3219 = vmatprep.mubr.bf16.mxu1 %v5494_v58 }
  0x9c   :  { %3108 = vmatpush1.bf16.msra.mxu0 %v4760_v47  ;;  %3190 = vmatpush1.bf16.msra.mxu1 %v4763_v49  ;;  %v4850_v47 = vld [vmem:[#allocation5 + $0xa10] ss:$80 sps:$4 sm:$0xff]   ;;  %v4853_v49 = vld [vmem:[#allocation5 + $0xa18] ss:$80 sps:$4 sm:$0xff]  }
  0x9d   :  { %3109 = vmatprep.subr.bf16.mxu0 %v4768_v50  ;;  %3191 = vmatprep.subr.bf16.mxu1 %v4771_v51  ;;  %v4858_v50 = vld [vmem:[#allocation5 + $0xab4] ss:$80 sps:$4 sm:$0xff]   ;;  %v4861_v51 = vld [vmem:[#allocation5 + $0xabc] ss:$80 sps:$4 sm:$0xff]  }
  0xa0   :  { %3110 = vmatpush1.bf16.msra.mxu0 %v4766_v52  ;;  %3192 = vmatpush1.bf16.msra.mxu1 %v4769_v53  ;;  %v4856_v52 = vld [vmem:[#allocation5 + $0xab0] ss:$80 sps:$4 sm:$0xff]   ;;  %v4859_v53 = vld [vmem:[#allocation5 + $0xab8] ss:$80 sps:$4 sm:$0xff]  }
  0xa1   :  { %3111 = vmatprep.subr.bf16.mxu0 %v4774_v54  ;;  %3193 = vmatprep.subr.bf16.mxu1 %v4777_v55  ;;  %v4864_v54 = vld [vmem:[#allocation5 + $0xb54] ss:$80 sps:$4 sm:$0xff]   ;;  %v4867_v55 = vld [vmem:[#allocation5 + $0xb5c] ss:$80 sps:$4 sm:$0xff]  }
  0xa4   :  { %3112 = vmatpush1.bf16.msra.mxu0 %v4772_v56  ;;  %3194 = vmatpush1.bf16.msra.mxu1 %v4775_v57  ;;  %v4862_v56 = vld [vmem:[#allocation5 + $0xb50] ss:$80 sps:$4 sm:$0xff]   ;;  %v4865_v57 = vld [vmem:[#allocation5 + $0xb58] ss:$80 sps:$4 sm:$0xff]  }
  0xa5   :  { %3113 = vmatprep.subr.bf16.mxu0 %v4780_v59  ;;  %3195 = vmatprep.subr.bf16.mxu1 %v4783_v60  ;;  %v4870_v59 = vld [vmem:[#allocation5 + $0xbf4] ss:$80 sps:$4 sm:$0xff]   ;;  %v4873_v60 = vld [vmem:[#allocation5 + $0xbfc] ss:$80 sps:$4 sm:$0xff]  }
  0xa8   :  { %3114 = vmatpush1.bf16.msra.mxu0 %v4778_v61  ;;  %3196 = vmatpush1.bf16.msra.mxu1 %v4781_v62  ;;  %v4868_v61 = vld [vmem:[#allocation5 + $0xbf0] ss:$80 sps:$4 sm:$0xff]   ;;  %v4871_v62 = vld [vmem:[#allocation5 + $0xbf8] ss:$80 sps:$4 sm:$0xff]  }
  0xa9   :  { %3115 = vmatprep.subr.bf16.mxu0 %v4786_v63  ;;  %3197 = vmatprep.subr.bf16.mxu1 %v4789_v0  ;;  %v4876_v63 = vld [vmem:[#allocation5 + $0xc94] ss:$80 sps:$4 sm:$0xff]   ;;  %v4879_v0 = vld [vmem:[#allocation5 + $0xc9c] ss:$80 sps:$4 sm:$0xff]  }
  0xac   :  { %3116 = vmatpush1.bf16.msra.mxu0 %v4784_v1  ;;  %3198 = vmatpush1.bf16.msra.mxu1 %v4787_v2  ;;  %v4874_v1 = vld [vmem:[#allocation5 + $0xc90] ss:$80 sps:$4 sm:$0xff]   ;;  %v4877_v2 = vld [vmem:[#allocation5 + $0xc98] ss:$80 sps:$4 sm:$0xff]  }
  0xad   :  { %3117 = vmatprep.subr.bf16.mxu0 %v4792_v3  ;;  %3199 = vmatprep.subr.bf16.mxu1 %v4795_v4  ;;  %v4882_v3 = vld [vmem:[#allocation5 + $0xd34] ss:$80 sps:$4 sm:$0xff]   ;;  %v4885_v4 = vld [vmem:[#allocation5 + $0xd3c] ss:$80 sps:$4 sm:$0xff]  }
  0xb0   :  { %3118 = vmatpush1.bf16.msra.mxu0 %v4790_v5  ;;  %3200 = vmatpush1.bf16.msra.mxu1 %v4793_v6  ;;  %v4880_v5 = vld [vmem:[#allocation5 + $0xd30] ss:$80 sps:$4 sm:$0xff]   ;;  %v4883_v6 = vld [vmem:[#allocation5 + $0xd38] ss:$80 sps:$4 sm:$0xff]  }
  0xb1   :  { %3119 = vmatprep.subr.bf16.mxu0 %v4798_v7  ;;  %3201 = vmatprep.subr.bf16.mxu1 %v4801_v8  ;;  %v4888_v7 = vld [vmem:[#allocation5 + $0xdd4] ss:$80 sps:$4 sm:$0xff]   ;;  %v4891_v8 = vld [vmem:[#allocation5 + $0xddc] ss:$80 sps:$4 sm:$0xff]  }
  0xb4   :  { %3120 = vmatpush1.bf16.msra.mxu0 %v4796_v9  ;;  %3202 = vmatpush1.bf16.msra.mxu1 %v4799_v10  ;;  %v4886_v9 = vld [vmem:[#allocation5 + $0xdd0] ss:$80 sps:$4 sm:$0xff]   ;;  %v4889_v10 = vld [vmem:[#allocation5 + $0xdd8] ss:$80 sps:$4 sm:$0xff]  }
  0xb5   :  { %3121 = vmatprep.subr.bf16.mxu0 %v4804_v11  ;;  %3203 = vmatprep.subr.bf16.mxu1 %v4807_v12  ;;  %v4894_v11 = vld [vmem:[#allocation5 + $0xe74] ss:$80 sps:$4 sm:$0xff]   ;;  %v4897_v12 = vld [vmem:[#allocation5 + $0xe7c] ss:$80 sps:$4 sm:$0xff]  }
  0xb8   :  { %3122 = vmatpush1.bf16.msra.mxu0 %v4802_v13  ;;  %3204 = vmatpush1.bf16.msra.mxu1 %v4805_v14  ;;  %v4892_v13 = vld [vmem:[#allocation5 + $0xe70] ss:$80 sps:$4 sm:$0xff]   ;;  %v4895_v14 = vld [vmem:[#allocation5 + $0xe78] ss:$80 sps:$4 sm:$0xff]  }
  0xb9   :  { %3123 = vmatprep.subr.bf16.mxu0 %v4810_v16  ;;  %3205 = vmatprep.subr.bf16.mxu1 %v4813_v17  ;;  %v4900_v16 = vld [vmem:[#allocation5 + $0x24] ss:$80 sps:$4 sm:$0xff]   ;;  %v4903_v17 = vld [vmem:[#allocation5 + $0x2c] ss:$80 sps:$4 sm:$0xff]  }
  0xbc   :  { %3124 = vmatpush1.bf16.msra.mxu0 %v4808_v18  ;;  %3206 = vmatpush1.bf16.msra.mxu1 %v4811_v19  ;;  %v4898_v18 = vld [vmem:[#allocation5 + $0x20] ss:$80 sps:$4 sm:$0xff]   ;;  %v4901_v19 = vld [vmem:[#allocation5 + $0x28] ss:$80 sps:$4 sm:$0xff]  }
  0xbd   :  { %3125 = vmatprep.subr.bf16.mxu0 %v4816_v20  ;;  %3207 = vmatprep.subr.bf16.mxu1 %v4819_v21  ;;  %v4906_v20 = vld [vmem:[#allocation5 + $0xc4] ss:$80 sps:$4 sm:$0xff]   ;;  %v4909_v21 = vld [vmem:[#allocation5 + $0xcc] ss:$80 sps:$4 sm:$0xff]  }
  0xc0   :  { %3126 = vmatpush1.bf16.msra.mxu0 %v4814_v22  ;;  %3208 = vmatpush1.bf16.msra.mxu1 %v4817_v23  ;;  %v4904_v22 = vld [vmem:[#allocation5 + $0xc0] ss:$80 sps:$4 sm:$0xff]   ;;  %v4907_v23 = vld [vmem:[#allocation5 + $0xc8] ss:$80 sps:$4 sm:$0xff]  }
  0xc1   :  { %3127 = vmatprep.subr.bf16.mxu0 %v4822_v24  ;;  %3209 = vmatprep.subr.bf16.mxu1 %v4825_v25  ;;  %v4912_v24 = vld [vmem:[#allocation5 + $0x164] ss:$80 sps:$4 sm:$0xff]   ;;  %v4915_v25 = vld [vmem:[#allocation5 + $0x16c] ss:$80 sps:$4 sm:$0xff]  }
  0xc4   :  { %3128 = vmatpush1.bf16.msra.mxu0 %v4820_v26  ;;  %3210 = vmatpush1.bf16.msra.mxu1 %v4823_v27  ;;  %v4910_v26 = vld [vmem:[#allocation5 + $0x160] ss:$80 sps:$4 sm:$0xff]   ;;  %v4913_v27 = vld [vmem:[#allocation5 + $0x168] ss:$80 sps:$4 sm:$0xff]  }
  0xc5   :  { %3129 = vmatprep.subr.bf16.mxu0 %v4828_v28  ;;  %3211 = vmatprep.subr.bf16.mxu1 %v4831_v29  ;;  %v4918_v28 = vld [vmem:[#allocation5 + $0x204] ss:$80 sps:$4 sm:$0xff]   ;;  %v4921_v29 = vld [vmem:[#allocation5 + $0x20c] ss:$80 sps:$4 sm:$0xff]  }
  0xc8   :  { %3130 = vmatpush1.bf16.msra.mxu0 %v4826_v30  ;;  %3212 = vmatpush1.bf16.msra.mxu1 %v4829_v31  ;;  %v4916_v30 = vld [vmem:[#allocation5 + $0x200] ss:$80 sps:$4 sm:$0xff]   ;;  %v4919_v31 = vld [vmem:[#allocation5 + $0x208] ss:$80 sps:$4 sm:$0xff]  }
  0xc9   :  { %3131 = vmatprep.subr.bf16.mxu0 %v4834_v32  ;;  %3213 = vmatprep.subr.bf16.mxu1 %v4837_v33  ;;  %v4924_v32 = vld [vmem:[#allocation5 + $0x2a4] ss:$80 sps:$4 sm:$0xff]   ;;  %v4927_v33 = vld [vmem:[#allocation5 + $0x2ac] ss:$80 sps:$4 sm:$0xff]  }
  0xcc   :  { %3132 = vmatpush1.bf16.msra.mxu0 %v4832_v34  ;;  %3214 = vmatpush1.bf16.msra.mxu1 %v4835_v35  ;;  %v4922_v34 = vld [vmem:[#allocation5 + $0x2a0] ss:$80 sps:$4 sm:$0xff]   ;;  %v4925_v35 = vld [vmem:[#allocation5 + $0x2a8] ss:$80 sps:$4 sm:$0xff]  }
  0xcd   :  { %3133 = vmatprep.subr.bf16.mxu0 %v4840_v36  ;;  %3215 = vmatprep.subr.bf16.mxu1 %v4843_v37  ;;  %v4930_v36 = vld [vmem:[#allocation5 + $0x344] ss:$80 sps:$4 sm:$0xff]   ;;  %v4933_v37 = vld [vmem:[#allocation5 + $0x34c] ss:$80 sps:$4 sm:$0xff]  }
  0xd0   :  { %3134 = vmatpush1.bf16.msra.mxu0 %v4838_v38  ;;  %3216 = vmatpush1.bf16.msra.mxu1 %v4841_v39  ;;  %v4928_v38 = vld [vmem:[#allocation5 + $0x340] ss:$80 sps:$4 sm:$0xff]   ;;  %v4931_v39 = vld [vmem:[#allocation5 + $0x348] ss:$80 sps:$4 sm:$0xff]  }
  0xd1   :  { %3135 = vmatprep.subr.bf16.mxu0 %v4846_v40  ;;  %3217 = vmatprep.subr.bf16.mxu1 %v4849_v41  ;;  %v4936_v40 = vld [vmem:[#allocation5 + $0x3e4] ss:$80 sps:$4 sm:$0xff]   ;;  %v4939_v41 = vld [vmem:[#allocation5 + $0x3ec] ss:$80 sps:$4 sm:$0xff]  }
  0xd4   :  { %3136 = vmatpush1.bf16.msra.mxu0 %v4844_v43  ;;  %3218 = vmatpush1.bf16.msra.mxu1 %v4847_v44  ;;  %v4934_v43 = vld [vmem:[#allocation5 + $0x3e0] ss:$80 sps:$4 sm:$0xff]   ;;  %v4937_v44 = vld [vmem:[#allocation5 + $0x3e8] ss:$80 sps:$4 sm:$0xff]  }
  0xd5   :  { %3146 = vmatprep.subr.bf16.mxu0 %v4852_v45  ;;  %3228 = vmatprep.subr.bf16.mxu1 %v4855_v46  ;;  %v4942_v45 = vld [vmem:[#allocation5 + $0x484] ss:$80 sps:$4 sm:$0xff]   ;;  %v4945_v46 = vld [vmem:[#allocation5 + $0x48c] ss:$80 sps:$4 sm:$0xff]  }
  0xd7   :  { %3138 = vmatmul.mubr.bf16.vlgmr.msra.gmra.mrb[4].mxu0 %v5487_v48  ;;  %3220 = vmatmul.mubr.bf16.vlgmr.msra.gmra.mrb[4].mxu1 %v5487_v48 }
  0xd8   :  { %3147 = vmatpush1.bf16.msra.mxu0 %v4850_v47  ;;  %3229 = vmatpush1.bf16.msra.mxu1 %v4853_v49  ;;  %v4940_v47 = vld [vmem:[#allocation5 + $0x480] ss:$80 sps:$4 sm:$0xff]   ;;  %v4943_v49 = vld [vmem:[#allocation5 + $0x488] ss:$80 sps:$4 sm:$0xff]  }
  0xd9   :  { %3148 = vmatprep.subr.bf16.mxu0 %v4858_v50  ;;  %3230 = vmatprep.subr.bf16.mxu1 %v4861_v51  ;;  %v4948_v50 = vld [vmem:[#allocation5 + $0x524] ss:$80 sps:$4 sm:$0xff]   ;;  %v4951_v51 = vld [vmem:[#allocation5 + $0x52c] ss:$80 sps:$4 sm:$0xff]  }
  0xda   :  { %3178 = vmatprep.mubr.bf16.mxu0 %v5429_v15  ;;  %3260 = vmatprep.mubr.bf16.mxu1 %v5429_v15 }
  0xdc   :  { %3149 = vmatpush1.bf16.msra.mxu0 %v4856_v52  ;;  %3231 = vmatpush1.bf16.msra.mxu1 %v4859_v53  ;;  %v4946_v52 = vld [vmem:[#allocation5 + $0x520] ss:$80 sps:$4 sm:$0xff]   ;;  %v4949_v53 = vld [vmem:[#allocation5 + $0x528] ss:$80 sps:$4 sm:$0xff]  }
  0xdd   :  { %3150 = vmatprep.subr.bf16.mxu0 %v4864_v54  ;;  %3232 = vmatprep.subr.bf16.mxu1 %v4867_v55  ;;  %v4954_v54 = vld [vmem:[#allocation5 + $0x5c4] ss:$80 sps:$4 sm:$0xff]   ;;  %v4957_v55 = vld [vmem:[#allocation5 + $0x5cc] ss:$80 sps:$4 sm:$0xff]  }
  0xe0   :  { %3151 = vmatpush1.bf16.msra.mxu0 %v4862_v56  ;;  %3233 = vmatpush1.bf16.msra.mxu1 %v4865_v57  ;;  %v4952_v56 = vld [vmem:[#allocation5 + $0x5c0] ss:$80 sps:$4 sm:$0xff]   ;;  %v4955_v57 = vld [vmem:[#allocation5 + $0x5c8] ss:$80 sps:$4 sm:$0xff]  }
  0xe1   :  { %3152 = vmatprep.subr.bf16.mxu0 %v4870_v59  ;;  %3234 = vmatprep.subr.bf16.mxu1 %v4873_v60  ;;  %v4960_v59 = vld [vmem:[#allocation5 + $0x664] ss:$80 sps:$4 sm:$0xff]   ;;  %v4963_v60 = vld [vmem:[#allocation5 + $0x66c] ss:$80 sps:$4 sm:$0xff]  }
  0xe4   :  { %3153 = vmatpush1.bf16.msra.mxu0 %v4868_v61  ;;  %3235 = vmatpush1.bf16.msra.mxu1 %v4871_v62  ;;  %v4958_v61 = vld [vmem:[#allocation5 + $0x660] ss:$80 sps:$4 sm:$0xff]   ;;  %v4961_v62 = vld [vmem:[#allocation5 + $0x668] ss:$80 sps:$4 sm:$0xff]  }
  0xe5   :  { %3154 = vmatprep.subr.bf16.mxu0 %v4876_v63  ;;  %3236 = vmatprep.subr.bf16.mxu1 %v4879_v0  ;;  %v4966_v63 = vld [vmem:[#allocation5 + $0x704] ss:$80 sps:$4 sm:$0xff]   ;;  %v4969_v0 = vld [vmem:[#allocation5 + $0x70c] ss:$80 sps:$4 sm:$0xff]  }
  0xe8   :  { %3155 = vmatpush1.bf16.msra.mxu0 %v4874_v1  ;;  %3237 = vmatpush1.bf16.msra.mxu1 %v4877_v2  ;;  %v4964_v1 = vld [vmem:[#allocation5 + $0x700] ss:$80 sps:$4 sm:$0xff]   ;;  %v4967_v2 = vld [vmem:[#allocation5 + $0x708] ss:$80 sps:$4 sm:$0xff]  }
  0xe9   :  { %3156 = vmatprep.subr.bf16.mxu0 %v4882_v3  ;;  %3238 = vmatprep.subr.bf16.mxu1 %v4885_v4  ;;  %v4972_v3 = vld [vmem:[#allocation5 + $0x7a4] ss:$80 sps:$4 sm:$0xff]   ;;  %v4975_v4 = vld [vmem:[#allocation5 + $0x7ac] ss:$80 sps:$4 sm:$0xff]  }
  0xec   :  { %3157 = vmatpush1.bf16.msra.mxu0 %v4880_v5  ;;  %3239 = vmatpush1.bf16.msra.mxu1 %v4883_v6  ;;  %v4970_v5 = vld [vmem:[#allocation5 + $0x7a0] ss:$80 sps:$4 sm:$0xff]   ;;  %v4973_v6 = vld [vmem:[#allocation5 + $0x7a8] ss:$80 sps:$4 sm:$0xff]  }
  0xed   :  { %3158 = vmatprep.subr.bf16.mxu0 %v4888_v7  ;;  %3240 = vmatprep.subr.bf16.mxu1 %v4891_v8  ;;  %v4978_v7 = vld [vmem:[#allocation5 + $0x844] ss:$80 sps:$4 sm:$0xff]   ;;  %v4981_v8 = vld [vmem:[#allocation5 + $0x84c] ss:$80 sps:$4 sm:$0xff]  }
  0xf0   :  { %3159 = vmatpush1.bf16.msra.mxu0 %v4886_v9  ;;  %3241 = vmatpush1.bf16.msra.mxu1 %v4889_v10  ;;  %v4976_v9 = vld [vmem:[#allocation5 + $0x840] ss:$80 sps:$4 sm:$0xff]   ;;  %v4979_v10 = vld [vmem:[#allocation5 + $0x848] ss:$80 sps:$4 sm:$0xff]  }
  0xf1   :  { %3160 = vmatprep.subr.bf16.mxu0 %v4894_v11  ;;  %3242 = vmatprep.subr.bf16.mxu1 %v4897_v12  ;;  %v4984_v11 = vld [vmem:[#allocation5 + $0x8e4] ss:$80 sps:$4 sm:$0xff]   ;;  %v4987_v12 = vld [vmem:[#allocation5 + $0x8ec] ss:$80 sps:$4 sm:$0xff]  }
  0xf4   :  { %3161 = vmatpush1.bf16.msra.mxu0 %v4892_v13  ;;  %3243 = vmatpush1.bf16.msra.mxu1 %v4895_v14  ;;  %v4982_v13 = vld [vmem:[#allocation5 + $0x8e0] ss:$80 sps:$4 sm:$0xff]   ;;  %v4985_v14 = vld [vmem:[#allocation5 + $0x8e8] ss:$80 sps:$4 sm:$0xff]  }
  0xf5   :  { %3269 = vmatprep.subr.bf16.mxu0 %v4900_v16  ;;  %3351 = vmatprep.subr.bf16.mxu1 %v4903_v17  ;;  %v4990_v16 = vld [vmem:[#allocation5 + $0x984] ss:$80 sps:$4 sm:$0xff]   ;;  %v4993_v17 = vld [vmem:[#allocation5 + $0x98c] ss:$80 sps:$4 sm:$0xff]  }
  0xf7   :  { %3179 = vmatmul.mubr.bf16.vlgmr.msra.gmra.mrb[4].mxu0 %v5504_v42  ;;  %3261 = vmatmul.mubr.bf16.vlgmr.msra.gmra.mrb[4].mxu1 %v5504_v42 }
  0xf8   :  { %3270 = vmatpush1.bf16.msra.mxu0 %v4898_v18  ;;  %3352 = vmatpush1.bf16.msra.mxu1 %v4901_v19  ;;  %v4988_v18 = vld [vmem:[#allocation5 + $0x980] ss:$80 sps:$4 sm:$0xff]   ;;  %v4991_v19 = vld [vmem:[#allocation5 + $0x988] ss:$80 sps:$4 sm:$0xff]  }
  0xf9   :  { %3271 = vmatprep.subr.bf16.mxu0 %v4906_v20  ;;  %3353 = vmatprep.subr.bf16.mxu1 %v4909_v21  ;;  %v4996_v20 = vld [vmem:[#allocation5 + $0xa24] ss:$80 sps:$4 sm:$0xff]   ;;  %v4999_v21 = vld [vmem:[#allocation5 + $0xa2c] ss:$80 sps:$4 sm:$0xff]  }
  0xfa   :  { %3301 = vmatprep.mubr.bf16.mxu0 %v5494_v58  ;;  %3383 = vmatprep.mubr.bf16.mxu1 %v5494_v58 }
  0xfc   :  { %3272 = vmatpush1.bf16.msra.mxu0 %v4904_v22  ;;  %3354 = vmatpush1.bf16.msra.mxu1 %v4907_v23  ;;  %v4994_v22 = vld [vmem:[#allocation5 + $0xa20] ss:$80 sps:$4 sm:$0xff]   ;;  %v4997_v23 = vld [vmem:[#allocation5 + $0xa28] ss:$80 sps:$4 sm:$0xff]  }
  0xfd   :  { %3273 = vmatprep.subr.bf16.mxu0 %v4912_v24  ;;  %3355 = vmatprep.subr.bf16.mxu1 %v4915_v25  ;;  %v5002_v24 = vld [vmem:[#allocation5 + $0xac4] ss:$80 sps:$4 sm:$0xff]   ;;  %v5005_v25 = vld [vmem:[#allocation5 + $0xacc] ss:$80 sps:$4 sm:$0xff]  }
 0x100   :  { %3274 = vmatpush1.bf16.msra.mxu0 %v4910_v26  ;;  %3356 = vmatpush1.bf16.msra.mxu1 %v4913_v27  ;;  %v5000_v26 = vld [vmem:[#allocation5 + $0xac0] ss:$80 sps:$4 sm:$0xff]   ;;  %v5003_v27 = vld [vmem:[#allocation5 + $0xac8] ss:$80 sps:$4 sm:$0xff]  }
 0x101   :  { %3275 = vmatprep.subr.bf16.mxu0 %v4918_v28  ;;  %3357 = vmatprep.subr.bf16.mxu1 %v4921_v29  ;;  %v5008_v28 = vld [vmem:[#allocation5 + $0xb64] ss:$80 sps:$4 sm:$0xff]   ;;  %v5011_v29 = vld [vmem:[#allocation5 + $0xb6c] ss:$80 sps:$4 sm:$0xff]  }
 0x104   :  { %3276 = vmatpush1.bf16.msra.mxu0 %v4916_v30  ;;  %3358 = vmatpush1.bf16.msra.mxu1 %v4919_v31  ;;  %v5006_v30 = vld [vmem:[#allocation5 + $0xb60] ss:$80 sps:$4 sm:$0xff]   ;;  %v5009_v31 = vld [vmem:[#allocation5 + $0xb68] ss:$80 sps:$4 sm:$0xff]  }
 0x105   :  { %3277 = vmatprep.subr.bf16.mxu0 %v4924_v32  ;;  %3359 = vmatprep.subr.bf16.mxu1 %v4927_v33  ;;  %v5014_v32 = vld [vmem:[#allocation5 + $0xc04] ss:$80 sps:$4 sm:$0xff]   ;;  %v5017_v33 = vld [vmem:[#allocation5 + $0xc0c] ss:$80 sps:$4 sm:$0xff]  }
 0x108   :  { %3278 = vmatpush1.bf16.msra.mxu0 %v4922_v34  ;;  %3360 = vmatpush1.bf16.msra.mxu1 %v4925_v35  ;;  %v5012_v34 = vld [vmem:[#allocation5 + $0xc00] ss:$80 sps:$4 sm:$0xff]   ;;  %v5015_v35 = vld [vmem:[#allocation5 + $0xc08] ss:$80 sps:$4 sm:$0xff]  }
 0x109   :  { %3279 = vmatprep.subr.bf16.mxu0 %v4930_v36  ;;  %3361 = vmatprep.subr.bf16.mxu1 %v4933_v37  ;;  %v5020_v36 = vld [vmem:[#allocation5 + $0xca4] ss:$80 sps:$4 sm:$0xff]   ;;  %v5023_v37 = vld [vmem:[#allocation5 + $0xcac] ss:$80 sps:$4 sm:$0xff]  }
 0x10c   :  { %3280 = vmatpush1.bf16.msra.mxu0 %v4928_v38  ;;  %3362 = vmatpush1.bf16.msra.mxu1 %v4931_v39  ;;  %v5018_v38 = vld [vmem:[#allocation5 + $0xca0] ss:$80 sps:$4 sm:$0xff]   ;;  %v5021_v39 = vld [vmem:[#allocation5 + $0xca8] ss:$80 sps:$4 sm:$0xff]  }
 0x10d   :  { %3281 = vmatprep.subr.bf16.mxu0 %v4936_v40  ;;  %3363 = vmatprep.subr.bf16.mxu1 %v4939_v41  ;;  %v5026_v40 = vld [vmem:[#allocation5 + $0xd44] ss:$80 sps:$4 sm:$0xff]   ;;  %v5029_v41 = vld [vmem:[#allocation5 + $0xd4c] ss:$80 sps:$4 sm:$0xff]  }
 0x110   :  { %3282 = vmatpush1.bf16.msra.mxu0 %v4934_v43  ;;  %3364 = vmatpush1.bf16.msra.mxu1 %v4937_v44  ;;  %v5024_v43 = vld [vmem:[#allocation5 + $0xd40] ss:$80 sps:$4 sm:$0xff]   ;;  %v5027_v44 = vld [vmem:[#allocation5 + $0xd48] ss:$80 sps:$4 sm:$0xff]  }
 0x111   :  { %3283 = vmatprep.subr.bf16.mxu0 %v4942_v45  ;;  %3365 = vmatprep.subr.bf16.mxu1 %v4945_v46  ;;  %v5032_v45 = vld [vmem:[#allocation5 + $0xde4] ss:$80 sps:$4 sm:$0xff]   ;;  %v5035_v46 = vld [vmem:[#allocation5 + $0xdec] ss:$80 sps:$4 sm:$0xff]  }
 0x114   :  { %3284 = vmatpush1.bf16.msra.mxu0 %v4940_v47  ;;  %3366 = vmatpush1.bf16.msra.mxu1 %v4943_v49  ;;  %v5030_v47 = vld [vmem:[#allocation5 + $0xde0] ss:$80 sps:$4 sm:$0xff]   ;;  %v5033_v49 = vld [vmem:[#allocation5 + $0xde8] ss:$80 sps:$4 sm:$0xff]  }
 0x115   :  { %3285 = vmatprep.subr.bf16.mxu0 %v4948_v50  ;;  %3367 = vmatprep.subr.bf16.mxu1 %v4951_v51  ;;  %v5038_v50 = vld [vmem:[#allocation5 + $0xe84] ss:$80 sps:$4 sm:$0xff]   ;;  %v5041_v51 = vld [vmem:[#allocation5 + $0xe8c] ss:$80 sps:$4 sm:$0xff]  }
 0x118   :  { %3286 = vmatpush1.bf16.msra.mxu0 %v4946_v52  ;;  %3368 = vmatpush1.bf16.msra.mxu1 %v4949_v53  ;;  %v5036_v52 = vld [vmem:[#allocation5 + $0xe80] ss:$80 sps:$4 sm:$0xff]   ;;  %v5039_v53 = vld [vmem:[#allocation5 + $0xe88] ss:$80 sps:$4 sm:$0xff]  }
 0x119   :  { %3287 = vmatprep.subr.bf16.mxu0 %v4954_v54  ;;  %3369 = vmatprep.subr.bf16.mxu1 %v4957_v55  ;;  %v5044_v54 = vld [vmem:[#allocation5 + $0x34] ss:$80 sps:$4 sm:$0xff]   ;;  %v5047_v55 = vld [vmem:[#allocation5 + $0x3c] ss:$80 sps:$4 sm:$0xff]  }
 0x11c   :  { %3288 = vmatpush1.bf16.msra.mxu0 %v4952_v56  ;;  %3370 = vmatpush1.bf16.msra.mxu1 %v4955_v57  ;;  %v5042_v56 = vld [vmem:[#allocation5 + $0x30] ss:$80 sps:$4 sm:$0xff]   ;;  %v5045_v57 = vld [vmem:[#allocation5 + $0x38] ss:$80 sps:$4 sm:$0xff]  }
 0x11d   :  { %3289 = vmatprep.subr.bf16.mxu0 %v4960_v59  ;;  %3371 = vmatprep.subr.bf16.mxu1 %v4963_v60  ;;  %v5050_v59 = vld [vmem:[#allocation5 + $0xd4] ss:$80 sps:$4 sm:$0xff]   ;;  %v5053_v60 = vld [vmem:[#allocation5 + $0xdc] ss:$80 sps:$4 sm:$0xff]  }
 0x120   :  { %3290 = vmatpush1.bf16.msra.mxu0 %v4958_v61  ;;  %3372 = vmatpush1.bf16.msra.mxu1 %v4961_v62  ;;  %v5048_v61 = vld [vmem:[#allocation5 + $0xd0] ss:$80 sps:$4 sm:$0xff]   ;;  %v5051_v62 = vld [vmem:[#allocation5 + $0xd8] ss:$80 sps:$4 sm:$0xff]  }
 0x121   :  { %3291 = vmatprep.subr.bf16.mxu0 %v4966_v63  ;;  %3373 = vmatprep.subr.bf16.mxu1 %v4969_v0  ;;  %v5056_v63 = vld [vmem:[#allocation5 + $0x174] ss:$80 sps:$4 sm:$0xff]   ;;  %v5059_v0 = vld [vmem:[#allocation5 + $0x17c] ss:$80 sps:$4 sm:$0xff]  }
 0x124   :  { %3292 = vmatpush1.bf16.msra.mxu0 %v4964_v1  ;;  %3374 = vmatpush1.bf16.msra.mxu1 %v4967_v2  ;;  %v5054_v1 = vld [vmem:[#allocation5 + $0x170] ss:$80 sps:$4 sm:$0xff]   ;;  %v5057_v2 = vld [vmem:[#allocation5 + $0x178] ss:$80 sps:$4 sm:$0xff]  }
 0x125   :  { %3293 = vmatprep.subr.bf16.mxu0 %v4972_v3  ;;  %3375 = vmatprep.subr.bf16.mxu1 %v4975_v4  ;;  %v3767_v3 = vlaneseq  ;;  %v5062_v4 = vld [vmem:[#allocation5 + $0x214] ss:$80 sps:$4 sm:$0xff]  }
 0x128   :  { %3294 = vmatpush1.bf16.msra.mxu0 %v4970_v5  ;;  %3376 = vmatpush1.bf16.msra.mxu1 %v4973_v6  ;;  %v5065_v5 = vld [vmem:[#allocation5 + $0x21c] ss:$80 sps:$4 sm:$0xff]   ;;  %v5060_v6 = vld [vmem:[#allocation5 + $0x210] ss:$80 sps:$4 sm:$0xff]  }
 0x129   :  { %3295 = vmatprep.subr.bf16.mxu0 %v4978_v7  ;;  %3377 = vmatprep.subr.bf16.mxu1 %v4981_v8  ;;  %v5063_v7 = vld [vmem:[#allocation5 + $0x218] ss:$80 sps:$4 sm:$0xff]   ;;  %v5526_v8 = vshrl.u32 %v3767_v3, 7 }
 0x12c   :  { %3296 = vmatpush1.bf16.msra.mxu0 %v4976_v9  ;;  %3378 = vmatpush1.bf16.msra.mxu1 %v4979_v10  ;;  %v5068_v9 = vld [vmem:[#allocation5 + $0x2b4] ss:$80 sps:$4 sm:$0xff]   ;;  %v5071_v10 = vld [vmem:[#allocation5 + $0x2bc] ss:$80 sps:$4 sm:$0xff]  }
 0x12d   :  { %3297 = vmatprep.subr.bf16.mxu0 %v4984_v11  ;;  %3379 = vmatprep.subr.bf16.mxu1 %v4987_v12  ;;  %v5066_v11 = vld [vmem:[#allocation5 + $0x2b0] ss:$80 sps:$4 sm:$0xff]   ;;  %v5069_v12 = vld [vmem:[#allocation5 + $0x2b8] ss:$80 sps:$4 sm:$0xff]  }
 0x130   :  { %3298 = vmatpush1.bf16.msra.mxu0 %v4982_v13  ;;  %3380 = vmatpush1.bf16.msra.mxu1 %v4985_v14  ;;  %v5528_v13 = vld [vmem:[#allocation7] sm:$0xff]  ;;  %v5531_v14 = vsub.s32 0, %v5526_v8 }
 0x131   :  { %3299 = vmatprep.subr.bf16.mxu0 %v4990_v16  ;;  %3381 = vmatprep.subr.bf16.mxu1 %v4993_v17  ;;  %v5534_v16 = vsub.s32 2, %v5526_v8  ;;  %v5074_v17 = vld [vmem:[#allocation5 + $0x354] ss:$80 sps:$4 sm:$0xff]  }
 0x134   :  { %3300 = vmatpush1.bf16.msra.mxu0 %v4988_v18  ;;  %3382 = vmatpush1.bf16.msra.mxu1 %v4991_v19  ;;  %v5077_v18 = vld [vmem:[#allocation5 + $0x35c] ss:$80 sps:$4 sm:$0xff]   ;;  %v5537_v19 = vsub.s32 1, %v5526_v8 }
 0x135   :  { %3310 = vmatprep.subr.bf16.mxu0 %v4996_v20  ;;  %3392 = vmatprep.subr.bf16.mxu1 %v4999_v21  ;;  %v5540_v20 = vsub.s32 3, %v5526_v8  ;;  %v3770_v21 = vrot.slane %v5528_v13, %v5531_v14 }
 0x137   :  { %3302 = vmatmul.mubr.bf16.vlgmr.msra.gmra.mrb[8].mxu0 %v5487_v48  ;;  %3384 = vmatmul.mubr.bf16.vlgmr.msra.gmra.mrb[8].mxu1 %v5487_v48 }
 0x138   :  { %3311 = vmatpush1.bf16.msra.mxu0 %v4994_v22  ;;  %3393 = vmatpush1.bf16.msra.mxu1 %v4997_v23  ;;  %v5072_v22 = vld [vmem:[#allocation5 + $0x350] ss:$80 sps:$4 sm:$0xff]   ;;  %v5075_v23 = vld [vmem:[#allocation5 + $0x358] ss:$80 sps:$4 sm:$0xff]  }
 0x139   :  { %3312 = vmatprep.subr.bf16.mxu0 %v5002_v24  ;;  %3394 = vmatprep.subr.bf16.mxu1 %v5005_v25  ;;  %v3778_v24 = vrot.slane %v5528_v13, %v5534_v16  ;;  %v5080_v25 = vld [vmem:[#allocation5 + $0x3f4] ss:$80 sps:$4 sm:$0xff]  }
 0x13a   :  { %3342 = vmatprep.mubr.bf16.mxu0 %v5429_v15  ;;  %3424 = vmatprep.mubr.bf16.mxu1 %v5429_v15 }
 0x13c   :  { %3313 = vmatpush1.bf16.msra.mxu0 %v5000_v26  ;;  %3395 = vmatpush1.bf16.msra.mxu1 %v5003_v27  ;;  %v5083_v26 = vld [vmem:[#allocation5 + $0x3fc] ss:$80 sps:$4 sm:$0xff]  }
 0x13d   :  { %3314 = vmatprep.subr.bf16.mxu0 %v5008_v28  ;;  %3396 = vmatprep.subr.bf16.mxu1 %v5011_v29  ;;  %v3774_v29 = vrot.slane %v5528_v13, %v5537_v19 }
 0x140   :  { %3315 = vmatpush1.bf16.msra.mxu0 %v5006_v30  ;;  %3397 = vmatpush1.bf16.msra.mxu1 %v5009_v31  ;;  %v3782_v30 = vrot.slane %v5528_v13, %v5540_v20 }
 0x141   :  { %3316 = vmatprep.subr.bf16.mxu0 %v5014_v32  ;;  %3398 = vmatprep.subr.bf16.mxu1 %v5017_v33 }
 0x144   :  { %3317 = vmatpush1.bf16.msra.mxu0 %v5012_v34  ;;  %3399 = vmatpush1.bf16.msra.mxu1 %v5015_v35  ;;  %v5078_v35 = vld [vmem:[#allocation5 + $0x3f0] ss:$80 sps:$4 sm:$0xff]  }
 0x145   :  { %3318 = vmatprep.subr.bf16.mxu0 %v5020_v36  ;;  %3400 = vmatprep.subr.bf16.mxu1 %v5023_v37 }
 0x148   :  { %3319 = vmatpush1.bf16.msra.mxu0 %v5018_v38  ;;  %3401 = vmatpush1.bf16.msra.mxu1 %v5021_v39 }
 0x149   :  { %3320 = vmatprep.subr.bf16.mxu0 %v5026_v40  ;;  %3402 = vmatprep.subr.bf16.mxu1 %v5029_v41  ;;  %v5081_v41 = vld [vmem:[#allocation5 + $0x3f8] ss:$80 sps:$4 sm:$0xff]  }
 0x14c   :  { %3321 = vmatpush1.bf16.msra.mxu0 %v5024_v43  ;;  %3403 = vmatpush1.bf16.msra.mxu1 %v5027_v44 }
 0x14d   :  { %3322 = vmatprep.subr.bf16.mxu0 %v5032_v45  ;;  %3404 = vmatprep.subr.bf16.mxu1 %v5035_v46 }
 0x150   :  { %3323 = vmatpush1.bf16.msra.mxu0 %v5030_v47  ;;  %3405 = vmatpush1.bf16.msra.mxu1 %v5033_v49  ;;  %v5086_v49 = vld [vmem:[#allocation5 + $0x494] ss:$80 sps:$4 sm:$0xff]  }
 0x151   :  { %3324 = vmatprep.subr.bf16.mxu0 %v5038_v50  ;;  %3406 = vmatprep.subr.bf16.mxu1 %v5041_v51  ;;  %v5089_v50 = vld [vmem:[#allocation5 + $0x49c] ss:$80 sps:$4 sm:$0xff]  }
 0x154   :  { %3325 = vmatpush1.bf16.msra.mxu0 %v5036_v52  ;;  %3407 = vmatpush1.bf16.msra.mxu1 %v5039_v53 }
 0x155   :  { %3433 = vmatprep.subr.bf16.mxu0 %v5044_v54  ;;  %3515 = vmatprep.subr.bf16.mxu1 %v5047_v55 }
 0x157   :  { %3343 = vmatmul.mubr.bf16.vlgmr.msra.gmra.mrb[8].mxu0 %v5504_v42  ;;  %3425 = vmatmul.mubr.bf16.vlgmr.msra.gmra.mrb[8].mxu1 %v5504_v42 }
 0x158   :  { %3434 = vmatpush1.bf16.msra.mxu0 %v5042_v56  ;;  %3516 = vmatpush1.bf16.msra.mxu1 %v5045_v57 }
 0x159   :  { %3435 = vmatprep.subr.bf16.mxu0 %v5050_v59  ;;  %3517 = vmatprep.subr.bf16.mxu1 %v5053_v60  ;;  %v5084_v60 = vld [vmem:[#allocation5 + $0x490] ss:$80 sps:$4 sm:$0xff]  }
 0x15a   :  { %3465 = vmatprep.mubr.bf16.mxu0 %v5494_v58  ;;  %3547 = vmatprep.mubr.bf16.mxu1 %v5494_v58 }
 0x15c   :  { %3436 = vmatpush1.bf16.msra.mxu0 %v5048_v61  ;;  %3518 = vmatpush1.bf16.msra.mxu1 %v5051_v62  ;;  %v5087_v61 = vld [vmem:[#allocation5 + $0x498] ss:$80 sps:$4 sm:$0xff]  }
 0x15d   :  { %3437 = vmatprep.subr.bf16.mxu0 %v5056_v63  ;;  %3519 = vmatprep.subr.bf16.mxu1 %v5059_v0  ;;  %v5092_v0 = vld [vmem:[#allocation5 + $0x534] ss:$80 sps:$4 sm:$0xff]  }
 0x160   :  { %3438 = vmatpush1.bf16.msra.mxu0 %v5054_v1  ;;  %3520 = vmatpush1.bf16.msra.mxu1 %v5057_v2  ;;  %v5095_v1 = vld [vmem:[#allocation5 + $0x53c] ss:$80 sps:$4 sm:$0xff]  }
 0x161   :  { %3439 = vmatprep.subr.bf16.mxu0 %v5062_v4  ;;  %3521 = vmatprep.subr.bf16.mxu1 %v5065_v5  ;;  %v5158_v4 = vld [vmem:[#allocation5 + $0xc14] ss:$80 sps:$4 sm:$0xff]  }
 0x164   :  { %3440 = vmatpush1.bf16.msra.mxu0 %v5060_v6  ;;  %3522 = vmatpush1.bf16.msra.mxu1 %v5063_v7  ;;  %v5156_v6 = vld [vmem:[#allocation5 + $0xc10] ss:$80 sps:$4 sm:$0xff]  }
 0x165   :  { %3441 = vmatprep.subr.bf16.mxu0 %v5068_v9  ;;  %3523 = vmatprep.subr.bf16.mxu1 %v5071_v10  ;;  %v5090_v9 = vld [vmem:[#allocation5 + $0x530] ss:$80 sps:$4 sm:$0xff]   ;;  %v5167_v10 = vld [vmem:[#allocation5 + $0xcbc] ss:$80 sps:$4 sm:$0xff]  }
 0x168   :  { %3442 = vmatpush1.bf16.msra.mxu0 %v5066_v11  ;;  %3524 = vmatpush1.bf16.msra.mxu1 %v5069_v12  ;;  %v5165_v12 = vld [vmem:[#allocation5 + $0xcb8] ss:$80 sps:$4 sm:$0xff]  }
 0x169   :  { %3443 = vmatprep.subr.bf16.mxu0 %v5074_v17  ;;  %3525 = vmatprep.subr.bf16.mxu1 %v5077_v18  ;;  %v5093_v18 = vld [vmem:[#allocation5 + $0x538] ss:$80 sps:$4 sm:$0xff]  }
 0x16a   :  { %v3016_v27 = vpop.f32.mrb[0].mxu0  ;;  %v3098_v28 = vpop.f32.mrb[0].mxu1 }
 0x16b   :  { %v4543_v31 = vadd.f32 -2.0, %v3016_v27  ;;  %v4545_v32 = vadd.f32 -2.0, %v3098_v28  ;;  %v3018_v33 = vpop.f32.mrb[1].mxu0  ;;  %v3100_v34 = vpop.f32.mrb[1].mxu1  ;;  %v3867_v36 = vsub.f32 %v3770_v21, %v3016_v27  ;;  %v3869_v44 = vsub.f32 %v3778_v24, %v3098_v28  ;;  %v5096_v27 = vld [vmem:[#allocation5 + $0x5d0] ss:$80 sps:$4 sm:$0xff]  }
 0x16c   :  { %v4544_v37 = vadd.f32 -2.0, %v3018_v33  ;;  %v4546_v38 = vadd.f32 -2.0, %v3100_v34  ;;  %v3020_v39 = vpop.f32.mrb[2].mxu0  ;;  %v3102_v40 = vpop.f32.mrb[2].mxu1  ;;  %3444 = vmatpush1.bf16.msra.mxu0 %v5072_v22  ;;  %3526 = vmatpush1.bf16.msra.mxu1 %v5075_v23  ;;  %v3868_v51 = vsub.f32 %v3774_v29, %v3018_v33  ;;  %v3870_v53 = vsub.f32 %v3782_v30, %v3100_v34  ;;  %v5098_v23 = vld [vmem:[#allocation5 + $0x5d4] ss:$80 sps:$4 sm:$0xff]  }
 0x16d   :  { %v3907_v43 = vsub.f32 %v4543_v31, %v3770_v21  ;;  %v3909_v45 = vsub.f32 %v4545_v32, %v3778_v24  ;;  %v3021_v46 = vpop.f32.mrb[3].mxu0  ;;  %v3103_v47 = vpop.f32.mrb[3].mxu1  ;;  %3445 = vmatprep.subr.bf16.mxu0 %v5080_v25  ;;  %3527 = vmatprep.subr.bf16.mxu1 %v5083_v26  ;;  %v5101_v24 = vld [vmem:[#allocation5 + $0x5dc] ss:$80 sps:$4 sm:$0xff]   ;;  %v5099_v28 = vld [vmem:[#allocation5 + $0x5d8] ss:$80 sps:$4 sm:$0xff]  }
 0x16e   :  { %v3908_v52 = vsub.f32 %v4544_v37, %v3774_v29  ;;  %v3910_v54 = vsub.f32 %v4546_v38, %v3782_v30  ;;  %v5104_v29 = vld [vmem:[#allocation5 + $0x674] ss:$80 sps:$4 sm:$0xff]   ;;  %v5107_v30 = vld [vmem:[#allocation5 + $0x67c] ss:$80 sps:$4 sm:$0xff]   ;;  %v5102_v31 = vld [vmem:[#allocation5 + $0x670] ss:$80 sps:$4 sm:$0xff]  }
 0x16f   :  { %v3927_v55 = vmax.f32 %v3867_v36, %v3907_v43  ;;  %v3929_v56 = vmax.f32 %v3869_v44, %v3909_v45  ;;  %v5105_v32 = vld [vmem:[#allocation5 + $0x678] ss:$80 sps:$4 sm:$0xff]   ;;  %v5110_v33 = vld [vmem:[#allocation5 + $0x714] ss:$80 sps:$4 sm:$0xff]   ;;  %v5113_v34 = vld [vmem:[#allocation5 + $0x71c] ss:$80 sps:$4 sm:$0xff]  }
 0x170   :  { %v3928_v57 = vmax.f32 %v3868_v51, %v3908_v52  ;;  %v3930_v59 = vmax.f32 %v3870_v53, %v3910_v54  ;;  %3446 = vmatpush1.bf16.msra.mxu0 %v5078_v35  ;;  %3528 = vmatpush1.bf16.msra.mxu1 %v5081_v41  ;;  %v5108_v35 = vld [vmem:[#allocation5 + $0x710] ss:$80 sps:$4 sm:$0xff]   ;;  %v5111_v36 = vld [vmem:[#allocation5 + $0x718] ss:$80 sps:$4 sm:$0xff]   ;;  %v5116_v37 = vld [vmem:[#allocation5 + $0x7b4] ss:$80 sps:$4 sm:$0xff]  }
 0x171   :  { %v3947_v62 = vmax.f32 %v3927_v55, 0.0  ;;  %v3949_v63 = vmax.f32 %v3929_v56, 0.0  ;;  %3447 = vmatprep.subr.bf16.mxu0 %v5086_v49  ;;  %3529 = vmatprep.subr.bf16.mxu1 %v5089_v50  ;;  %v5119_v38 = vld [vmem:[#allocation5 + $0x7bc] ss:$80 sps:$4 sm:$0xff]   ;;  %v5114_v39 = vld [vmem:[#allocation5 + $0x7b0] ss:$80 sps:$4 sm:$0xff]  }
 0x172   :  { %v3948_v2 = vmax.f32 %v3928_v57, 0.0  ;;  %v3950_v3 = vmax.f32 %v3930_v59, 0.0  ;;  %v5117_v40 = vld [vmem:[#allocation5 + $0x7b8] ss:$80 sps:$4 sm:$0xff]   ;;  %v5122_v41 = vld [vmem:[#allocation5 + $0x854] ss:$80 sps:$4 sm:$0xff]  }
 0x173   :  { %vm5550_vm0 = vcmp.le.f32.partialorder %v3947_v62, 2.0  ;;  %v3987_v5 = vsub.f32 1.0, %v3947_v62  ;;  %vm5554_vm1 = vcmp.le.f32.partialorder %v3949_v63, 2.0  ;;  %v3989_v7 = vsub.f32 1.0, %v3949_v63  ;;  %v5125_v43 = vld [vmem:[#allocation5 + $0x85c] ss:$80 sps:$4 sm:$0xff]  }
 0x174   :  { %vm5558_vm2 = vcmp.le.f32.partialorder %v3948_v2, 2.0  ;;  %v3988_v11 = vsub.f32 1.0, %v3948_v2  ;;  %vm5562_vm3 = vcmp.le.f32.partialorder %v3950_v3, 2.0  ;;  %v3990_v17 = vsub.f32 1.0, %v3950_v3  ;;  %3448 = vmatpush1.bf16.msra.mxu0 %v5084_v60  ;;  %3530 = vmatpush1.bf16.msra.mxu1 %v5087_v61  ;;  %v5120_v44 = vld [vmem:[#allocation5 + $0x850] ss:$80 sps:$4 sm:$0xff]  }
 0x175   :  { %v4007_v21 = vsel %vm5550_vm0, %v3987_v5, 0.0  ;;  %v4009_v22 = vsel %vm5554_vm1, %v3989_v7, 0.0  ;;  %3449 = vmatprep.subr.bf16.mxu0 %v5092_v0  ;;  %3531 = vmatprep.subr.bf16.mxu1 %v5095_v1  ;;  %v5123_v45 = vld [vmem:[#allocation5 + $0x858] ss:$80 sps:$4 sm:$0xff]   ;;  %v5128_v46 = vld [vmem:[#allocation5 + $0x8f4] ss:$80 sps:$4 sm:$0xff]  }
 0x176   :  { %4027 = vst [vmem:[#allocation8] sm:$0xff] %v4007_v21  ;;  %4029 = vst [vmem:[#allocation8 + $0x10] sm:$0xff] %v4009_v22  ;;  %v4008_v25 = vsel %vm5558_vm2, %v3988_v11, 0.0  ;;  %v4010_v26 = vsel %vm5562_vm3, %v3990_v17, 0.0  ;;  %v5131_v47 = vld [vmem:[#allocation5 + $0x8fc] ss:$80 sps:$4 sm:$0xff]  }
 0x177   :  { %4028 = vst [vmem:[#allocation8 + $0x8] sm:$0xff] %v4008_v25  ;;  %4030 = vst [vmem:[#allocation8 + $0x18] sm:$0xff] %v4010_v26  ;;  %v5126_v49 = vld [vmem:[#allocation5 + $0x8f0] ss:$80 sps:$4 sm:$0xff]   ;;  %v5129_v50 = vld [vmem:[#allocation5 + $0x8f8] ss:$80 sps:$4 sm:$0xff]  }
 0x178   :  { %3450 = vmatpush1.bf16.msra.mxu0 %v5090_v9  ;;  %3532 = vmatpush1.bf16.msra.mxu1 %v5093_v18  ;;  %v5134_v51 = vld [vmem:[#allocation5 + $0x994] ss:$80 sps:$4 sm:$0xff]   ;;  %v5137_v52 = vld [vmem:[#allocation5 + $0x99c] ss:$80 sps:$4 sm:$0xff]   ;;  %v5132_v53 = vld [vmem:[#allocation5 + $0x990] ss:$80 sps:$4 sm:$0xff]  }
 0x179   :  { %3451 = vmatprep.subr.bf16.mxu0 %v5098_v23  ;;  %3533 = vmatprep.subr.bf16.mxu1 %v5101_v24  ;;  %v5135_v54 = vld [vmem:[#allocation5 + $0x998] ss:$80 sps:$4 sm:$0xff]   ;;  %v5140_v55 = vld [vmem:[#allocation5 + $0xa34] ss:$80 sps:$4 sm:$0xff]   ;;  %v5143_v56 = vld [vmem:[#allocation5 + $0xa3c] ss:$80 sps:$4 sm:$0xff]  }
 0x17a   :  { %v5138_v57 = vld [vmem:[#allocation5 + $0xa30] ss:$80 sps:$4 sm:$0xff]   ;;  %v5141_v59 = vld [vmem:[#allocation5 + $0xa38] ss:$80 sps:$4 sm:$0xff]   ;;  %v5146_v60 = vld [vmem:[#allocation5 + $0xad4] ss:$80 sps:$4 sm:$0xff]  }
 0x17b   :  { %v5149_v61 = vld [vmem:[#allocation5 + $0xadc] ss:$80 sps:$4 sm:$0xff]   ;;  %v5144_v62 = vld [vmem:[#allocation5 + $0xad0] ss:$80 sps:$4 sm:$0xff]   ;;  %v5147_v63 = vld [vmem:[#allocation5 + $0xad8] ss:$80 sps:$4 sm:$0xff]  }
 0x17c   :  { %3452 = vmatpush1.bf16.msra.mxu0 %v5096_v27  ;;  %3534 = vmatpush1.bf16.msra.mxu1 %v5099_v28  ;;  %v5152_v0 = vld [vmem:[#allocation5 + $0xb74] ss:$80 sps:$4 sm:$0xff]   ;;  %v5155_v1 = vld [vmem:[#allocation5 + $0xb7c] ss:$80 sps:$4 sm:$0xff]   ;;  %v5150_v2 = vld [vmem:[#allocation5 + $0xb70] ss:$80 sps:$4 sm:$0xff]  }
 0x17d   :  { %3453 = vmatprep.subr.bf16.mxu0 %v5104_v29  ;;  %3535 = vmatprep.subr.bf16.mxu1 %v5107_v30  ;;  %v5153_v3 = vld [vmem:[#allocation5 + $0xb78] ss:$80 sps:$4 sm:$0xff]   ;;  %v5161_v5 = vld [vmem:[#allocation5 + $0xc1c] ss:$80 sps:$4 sm:$0xff]   ;;  %v5164_v9 = vld [vmem:[#allocation5 + $0xcb4] ss:$80 sps:$4 sm:$0xff]  }
 0x17e   :  { %v5159_v7 = vld [vmem:[#allocation5 + $0xc18] ss:$80 sps:$4 sm:$0xff]   ;;  %v5162_v11 = vld [vmem:[#allocation5 + $0xcb0] ss:$80 sps:$4 sm:$0xff]   ;;  %v5170_v17 = vld [vmem:[#allocation5 + $0xd54] ss:$80 sps:$4 sm:$0xff]  }
 0x17f   :  { %v5173_v18 = vld [vmem:[#allocation5 + $0xd5c] ss:$80 sps:$4 sm:$0xff]   ;;  %v5168_v21 = vld [vmem:[#allocation5 + $0xd50] ss:$80 sps:$4 sm:$0xff]   ;;  %v5171_v22 = vld [vmem:[#allocation5 + $0xd58] ss:$80 sps:$4 sm:$0xff]  }
 0x180   :  { %3454 = vmatpush1.bf16.msra.mxu0 %v5102_v31  ;;  %3536 = vmatpush1.bf16.msra.mxu1 %v5105_v32  ;;  %v5176_v23 = vld [vmem:[#allocation5 + $0xdf4] ss:$80 sps:$4 sm:$0xff]   ;;  %v5179_v24 = vld [vmem:[#allocation5 + $0xdfc] ss:$80 sps:$4 sm:$0xff]   ;;  %v5174_v25 = vld [vmem:[#allocation5 + $0xdf0] ss:$80 sps:$4 sm:$0xff]  }
 0x181   :  { %3455 = vmatprep.subr.bf16.mxu0 %v5110_v33  ;;  %3537 = vmatprep.subr.bf16.mxu1 %v5113_v34  ;;  %v5177_v26 = vld [vmem:[#allocation5 + $0xdf8] ss:$80 sps:$4 sm:$0xff]   ;;  %v5182_v27 = vld [vmem:[#allocation5 + $0xe94] ss:$80 sps:$4 sm:$0xff]   ;;  %v5185_v28 = vld [vmem:[#allocation5 + $0xe9c] ss:$80 sps:$4 sm:$0xff]  }
 0x182   :  { %v5180_v29 = vld [vmem:[#allocation5 + $0xe90] ss:$80 sps:$4 sm:$0xff]   ;;  %v5183_v30 = vld [vmem:[#allocation5 + $0xe98] ss:$80 sps:$4 sm:$0xff]   ;;  %v5188_v31 = vld [vmem:[#allocation5 + $0x44] ss:$80 sps:$4 sm:$0xff]  }
 0x183   :  { %v5191_v32 = vld [vmem:[#allocation5 + $0x4c] ss:$80 sps:$4 sm:$0xff]   ;;  %v5186_v33 = vld [vmem:[#allocation5 + $0x40] ss:$80 sps:$4 sm:$0xff]   ;;  %v5189_v34 = vld [vmem:[#allocation5 + $0x48] ss:$80 sps:$4 sm:$0xff]  }
 0x184   :  { %3456 = vmatpush1.bf16.msra.mxu0 %v5108_v35  ;;  %3538 = vmatpush1.bf16.msra.mxu1 %v5111_v36  ;;  %v5194_v35 = vld [vmem:[#allocation5 + $0xe4] ss:$80 sps:$4 sm:$0xff]   ;;  %v5197_v36 = vld [vmem:[#allocation5 + $0xec] ss:$80 sps:$4 sm:$0xff]  }
 0x185   :  { %3457 = vmatprep.subr.bf16.mxu0 %v5116_v37  ;;  %3539 = vmatprep.subr.bf16.mxu1 %v5119_v38  ;;  %v5192_v37 = vld [vmem:[#allocation5 + $0xe0] ss:$80 sps:$4 sm:$0xff]   ;;  %v5195_v38 = vld [vmem:[#allocation5 + $0xe8] ss:$80 sps:$4 sm:$0xff]  }
 0x188   :  { %3458 = vmatpush1.bf16.msra.mxu0 %v5114_v39  ;;  %3540 = vmatpush1.bf16.msra.mxu1 %v5117_v40  ;;  %v5200_v39 = vld [vmem:[#allocation5 + $0x184] ss:$80 sps:$4 sm:$0xff]   ;;  %v5203_v40 = vld [vmem:[#allocation5 + $0x18c] ss:$80 sps:$4 sm:$0xff]  }
 0x189   :  { %3459 = vmatprep.subr.bf16.mxu0 %v5122_v41  ;;  %3541 = vmatprep.subr.bf16.mxu1 %v5125_v43  ;;  %v5198_v41 = vld [vmem:[#allocation5 + $0x180] ss:$80 sps:$4 sm:$0xff]   ;;  %v5201_v43 = vld [vmem:[#allocation5 + $0x188] ss:$80 sps:$4 sm:$0xff]  }
 0x18c   :  { %3460 = vmatpush1.bf16.msra.mxu0 %v5120_v44  ;;  %3542 = vmatpush1.bf16.msra.mxu1 %v5123_v45  ;;  %v5206_v44 = vld [vmem:[#allocation5 + $0x224] ss:$80 sps:$4 sm:$0xff]   ;;  %v5209_v45 = vld [vmem:[#allocation5 + $0x22c] ss:$80 sps:$4 sm:$0xff]  }
 0x18d   :  { %3461 = vmatprep.subr.bf16.mxu0 %v5128_v46  ;;  %3543 = vmatprep.subr.bf16.mxu1 %v5131_v47  ;;  %v5204_v46 = vld [vmem:[#allocation5 + $0x220] ss:$80 sps:$4 sm:$0xff]   ;;  %v5207_v47 = vld [vmem:[#allocation5 + $0x228] ss:$80 sps:$4 sm:$0xff]  }
 0x190   :  { %3462 = vmatpush1.bf16.msra.mxu0 %v5126_v49  ;;  %3544 = vmatpush1.bf16.msra.mxu1 %v5129_v50  ;;  %v5212_v49 = vld [vmem:[#allocation5 + $0x2c4] ss:$80 sps:$4 sm:$0xff]   ;;  %v5215_v50 = vld [vmem:[#allocation5 + $0x2cc] ss:$80 sps:$4 sm:$0xff]  }
 0x191   :  { %3463 = vmatprep.subr.bf16.mxu0 %v5134_v51  ;;  %3545 = vmatprep.subr.bf16.mxu1 %v5137_v52  ;;  %v5210_v51 = vld [vmem:[#allocation5 + $0x2c0] ss:$80 sps:$4 sm:$0xff]   ;;  %v3785_v52 = vsub.s32 4, %v5526_v8 }
 0x194   :  { %3464 = vmatpush1.bf16.msra.mxu0 %v5132_v53  ;;  %3546 = vmatpush1.bf16.msra.mxu1 %v5135_v54  ;;  %v3793_v53 = vsub.s32 6, %v5526_v8  ;;  %v5218_v54 = vld [vmem:[#allocation5 + $0x364] ss:$80 sps:$4 sm:$0xff]  }
 0x195   :  { %3474 = vmatprep.subr.bf16.mxu0 %v5140_v55  ;;  %3556 = vmatprep.subr.bf16.mxu1 %v5143_v56  ;;  %v5221_v55 = vld [vmem:[#allocation5 + $0x36c] ss:$80 sps:$4 sm:$0xff]   ;;  %v3789_v56 = vsub.s32 5, %v5526_v8 }
 0x197   :  { %3466 = vmatmul.mubr.bf16.vlgmr.msra.gmra.mrb[12].mxu0 %v5487_v48  ;;  %3548 = vmatmul.mubr.bf16.vlgmr.msra.gmra.mrb[12].mxu1 %v5487_v48 }
 0x198   :  { %3475 = vmatpush1.bf16.msra.mxu0 %v5138_v57  ;;  %3557 = vmatpush1.bf16.msra.mxu1 %v5141_v59  ;;  %v3797_v57 = vsub.s32 7, %v5526_v8  ;;  %v3786_v59 = vrot.slane %v5528_v13, %v3785_v52 }
 0x199   :  { %3476 = vmatprep.subr.bf16.mxu0 %v5146_v60  ;;  %3558 = vmatprep.subr.bf16.mxu1 %v5149_v61  ;;  %v5216_v60 = vld [vmem:[#allocation5 + $0x360] ss:$80 sps:$4 sm:$0xff]   ;;  %v5219_v61 = vld [vmem:[#allocation5 + $0x368] ss:$80 sps:$4 sm:$0xff]  }
 0x19a   :  { %3506 = vmatprep.mubr.bf16.mxu0 %v5429_v15  ;;  %3588 = vmatprep.mubr.bf16.mxu1 %v5429_v15 }
 0x19c   :  { %3477 = vmatpush1.bf16.msra.mxu0 %v5144_v62  ;;  %3559 = vmatpush1.bf16.msra.mxu1 %v5147_v63  ;;  %v3794_v62 = vrot.slane %v5528_v13, %v3793_v53  ;;  %v5224_v63 = vld [vmem:[#allocation5 + $0x404] ss:$80 sps:$4 sm:$0xff]  }
 0x19d   :  { %3478 = vmatprep.subr.bf16.mxu0 %v5152_v0  ;;  %3560 = vmatprep.subr.bf16.mxu1 %v5155_v1  ;;  %v5227_v0 = vld [vmem:[#allocation5 + $0x40c] ss:$80 sps:$4 sm:$0xff]  }
 0x1a0   :  { %3479 = vmatpush1.bf16.msra.mxu0 %v5150_v2  ;;  %3561 = vmatpush1.bf16.msra.mxu1 %v5153_v3  ;;  %v3790_v3 = vrot.slane %v5528_v13, %v3789_v56 }
 0x1a1   :  { %3480 = vmatprep.subr.bf16.mxu0 %v5158_v4  ;;  %3562 = vmatprep.subr.bf16.mxu1 %v5161_v5  ;;  %v3798_v4 = vrot.slane %v5528_v13, %v3797_v57  ;;  %v5230_v13 = vld [vmem:[#allocation5 + $0x4a4] ss:$80 sps:$4 sm:$0xff]  }
 0x1a4   :  { %3481 = vmatpush1.bf16.msra.mxu0 %v5156_v6  ;;  %3563 = vmatpush1.bf16.msra.mxu1 %v5159_v7 }
 0x1a5   :  { %3482 = vmatprep.subr.bf16.mxu0 %v5164_v9  ;;  %3564 = vmatprep.subr.bf16.mxu1 %v5167_v10  ;;  %v5222_v10 = vld [vmem:[#allocation5 + $0x400] ss:$80 sps:$4 sm:$0xff]  }
 0x1a8   :  { %3483 = vmatpush1.bf16.msra.mxu0 %v5162_v11  ;;  %3565 = vmatpush1.bf16.msra.mxu1 %v5165_v12 }
 0x1a9   :  { %3484 = vmatprep.subr.bf16.mxu0 %v5170_v17  ;;  %3566 = vmatprep.subr.bf16.mxu1 %v5173_v18 }
 0x1ac   :  { %3485 = vmatpush1.bf16.msra.mxu0 %v5168_v21  ;;  %3567 = vmatpush1.bf16.msra.mxu1 %v5171_v22  ;;  %v5225_v22 = vld [vmem:[#allocation5 + $0x408] ss:$80 sps:$4 sm:$0xff]  }
 0x1ad   :  { %3486 = vmatprep.subr.bf16.mxu0 %v5176_v23  ;;  %3568 = vmatprep.subr.bf16.mxu1 %v5179_v24 }
 0x1b0   :  { %3487 = vmatpush1.bf16.msra.mxu0 %v5174_v25  ;;  %3569 = vmatpush1.bf16.msra.mxu1 %v5177_v26 }
 0x1b1   :  { %3488 = vmatprep.subr.bf16.mxu0 %v5182_v27  ;;  %3570 = vmatprep.subr.bf16.mxu1 %v5185_v28  ;;  %v5233_v28 = vld [vmem:[#allocation5 + $0x4ac] ss:$80 sps:$4 sm:$0xff]  }
 0x1b4   :  { %3489 = vmatpush1.bf16.msra.mxu0 %v5180_v29  ;;  %3571 = vmatpush1.bf16.msra.mxu1 %v5183_v30 }
 0x1b5   :  { %3597 = vmatprep.subr.bf16.mxu0 %v5188_v31  ;;  %3679 = vmatprep.subr.bf16.mxu1 %v5191_v32 }
 0x1b7   :  { %3507 = vmatmul.mubr.bf16.vlgmr.msra.gmra.mrb[12].mxu0 %v5504_v42  ;;  %3589 = vmatmul.mubr.bf16.vlgmr.msra.gmra.mrb[12].mxu1 %v5504_v42 }
 0x1b8   :  { %3598 = vmatpush1.bf16.msra.mxu0 %v5186_v33  ;;  %3680 = vmatpush1.bf16.msra.mxu1 %v5189_v34 }
 0x1b9   :  { %3599 = vmatprep.subr.bf16.mxu0 %v5194_v35  ;;  %3681 = vmatprep.subr.bf16.mxu1 %v5197_v36 }
 0x1ba   :  { %3629 = vmatprep.mubr.bf16.mxu0 %v5494_v58  ;;  %3711 = vmatprep.mubr.bf16.mxu1 %v5494_v58  ;;  %v5213_v58 = vld [vmem:[#allocation5 + $0x2c8] ss:$80 sps:$4 sm:$0xff]  }
 0x1bc   :  { %3600 = vmatpush1.bf16.msra.mxu0 %v5192_v37  ;;  %3682 = vmatpush1.bf16.msra.mxu1 %v5195_v38  ;;  %v5228_v37 = vld [vmem:[#allocation5 + $0x4a0] ss:$80 sps:$4 sm:$0xff]   ;;  %v5231_v38 = vld [vmem:[#allocation5 + $0x4a8] ss:$80 sps:$4 sm:$0xff]  }
 0x1bd   :  { %3601 = vmatprep.subr.bf16.mxu0 %v5200_v39  ;;  %3683 = vmatprep.subr.bf16.mxu1 %v5203_v40 }
 0x1c0   :  { %3602 = vmatpush1.bf16.msra.mxu0 %v5198_v41  ;;  %3684 = vmatpush1.bf16.msra.mxu1 %v5201_v43  ;;  %v5236_v41 = vld [vmem:[#allocation5 + $0x544] ss:$80 sps:$4 sm:$0xff]   ;;  %v5239_v43 = vld [vmem:[#allocation5 + $0x54c] ss:$80 sps:$4 sm:$0xff]  }
 0x1c1   :  { %3603 = vmatprep.subr.bf16.mxu0 %v5206_v44  ;;  %3685 = vmatprep.subr.bf16.mxu1 %v5209_v45 }
 0x1c4   :  { %3604 = vmatpush1.bf16.msra.mxu0 %v5204_v46  ;;  %3686 = vmatpush1.bf16.msra.mxu1 %v5207_v47  ;;  %v5294_v46 = vld [vmem:[#allocation5 + $0xb80] ss:$80 sps:$4 sm:$0xff]  }
 0x1c5   :  { %3605 = vmatprep.subr.bf16.mxu0 %v5212_v49  ;;  %3687 = vmatprep.subr.bf16.mxu1 %v5215_v50  ;;  %v5302_v49 = vld [vmem:[#allocation5 + $0xc24] ss:$80 sps:$4 sm:$0xff]  }
 0x1c8   :  { %3606 = vmatpush1.bf16.msra.mxu0 %v5210_v51  ;;  %3688 = vmatpush1.bf16.msra.mxu1 %v5213_v58  ;;  %v5234_v51 = vld [vmem:[#allocation5 + $0x540] ss:$80 sps:$4 sm:$0xff]   ;;  %v5308_v58 = vld [vmem:[#allocation5 + $0xcc4] ss:$80 sps:$4 sm:$0xff]  }
 0x1c9   :  { %3607 = vmatprep.subr.bf16.mxu0 %v5218_v54  ;;  %3689 = vmatprep.subr.bf16.mxu1 %v5221_v55  ;;  %v5306_v55 = vld [vmem:[#allocation5 + $0xcc0] ss:$80 sps:$4 sm:$0xff]  }
 0x1ca   :  { %v3180_v1 = vpop.f32.mrb[4].mxu0  ;;  %v3262_v2 = vpop.f32.mrb[4].mxu1 }
 0x1cb   :  { %v4547_v5 = vadd.f32 -2.0, %v3180_v1  ;;  %v4549_v6 = vadd.f32 -2.0, %v3262_v2  ;;  %v3182_v7 = vpop.f32.mrb[5].mxu0  ;;  %v3264_v9 = vpop.f32.mrb[5].mxu1  ;;  %v3871_v11 = vsub.f32 %v3786_v59, %v3180_v1  ;;  %v3873_v24 = vsub.f32 %v3794_v62, %v3262_v2 }
 0x1cc   :  { %v4548_v12 = vadd.f32 -2.0, %v3182_v7  ;;  %v4550_v17 = vadd.f32 -2.0, %v3264_v9  ;;  %v3184_v18 = vpop.f32.mrb[6].mxu0  ;;  %v3266_v21 = vpop.f32.mrb[6].mxu1  ;;  %3608 = vmatpush1.bf16.msra.mxu0 %v5216_v60  ;;  %3690 = vmatpush1.bf16.msra.mxu1 %v5219_v61  ;;  %v3872_v29 = vsub.f32 %v3790_v3, %v3182_v7  ;;  %v3874_v31 = vsub.f32 %v3798_v4, %v3264_v9  ;;  %v5237_v60 = vld [vmem:[#allocation5 + $0x548] ss:$80 sps:$4 sm:$0xff]  }
 0x1cd   :  { %v3911_v23 = vsub.f32 %v4547_v5, %v3786_v59  ;;  %v3913_v25 = vsub.f32 %v4549_v6, %v3794_v62  ;;  %v3185_v26 = vpop.f32.mrb[7].mxu0  ;;  %v3267_v27 = vpop.f32.mrb[7].mxu1  ;;  %3609 = vmatprep.subr.bf16.mxu0 %v5224_v63  ;;  %3691 = vmatprep.subr.bf16.mxu1 %v5227_v0  ;;  %v5242_v63 = vld [vmem:[#allocation5 + $0x5e4] ss:$80 sps:$4 sm:$0xff]   ;;  %v5245_v0 = vld [vmem:[#allocation5 + $0x5ec] ss:$80 sps:$4 sm:$0xff]  }
 0x1ce   :  { %v3912_v30 = vsub.f32 %v4548_v12, %v3790_v3  ;;  %v3914_v32 = vsub.f32 %v4550_v17, %v3798_v4  ;;  %v5240_v3 = vld [vmem:[#allocation5 + $0x5e0] ss:$80 sps:$4 sm:$0xff]   ;;  %v5243_v4 = vld [vmem:[#allocation5 + $0x5e8] ss:$80 sps:$4 sm:$0xff]   ;;  %v5248_v5 = vld [vmem:[#allocation5 + $0x684] ss:$80 sps:$4 sm:$0xff]  }
 0x1cf   :  { %v3931_v33 = vmax.f32 %v3871_v11, %v3911_v23  ;;  %v3933_v34 = vmax.f32 %v3873_v24, %v3913_v25  ;;  %v5251_v6 = vld [vmem:[#allocation5 + $0x68c] ss:$80 sps:$4 sm:$0xff]   ;;  %v5246_v7 = vld [vmem:[#allocation5 + $0x680] ss:$80 sps:$4 sm:$0xff]   ;;  %v5249_v9 = vld [vmem:[#allocation5 + $0x688] ss:$80 sps:$4 sm:$0xff]  }
 0x1d0   :  { %v3932_v35 = vmax.f32 %v3872_v29, %v3912_v30  ;;  %v3934_v36 = vmax.f32 %v3874_v31, %v3914_v32  ;;  %3610 = vmatpush1.bf16.msra.mxu0 %v5222_v10  ;;  %3692 = vmatpush1.bf16.msra.mxu1 %v5225_v22  ;;  %v5254_v10 = vld [vmem:[#allocation5 + $0x724] ss:$80 sps:$4 sm:$0xff]   ;;  %v5257_v11 = vld [vmem:[#allocation5 + $0x72c] ss:$80 sps:$4 sm:$0xff]   ;;  %v5252_v12 = vld [vmem:[#allocation5 + $0x720] ss:$80 sps:$4 sm:$0xff]  }
 0x1d1   :  { %v3951_v39 = vmax.f32 %v3931_v33, 0.0  ;;  %v3953_v40 = vmax.f32 %v3933_v34, 0.0  ;;  %3611 = vmatprep.subr.bf16.mxu0 %v5230_v13  ;;  %3693 = vmatprep.subr.bf16.mxu1 %v5233_v28  ;;  %v5255_v17 = vld [vmem:[#allocation5 + $0x728] ss:$80 sps:$4 sm:$0xff]   ;;  %v5260_v18 = vld [vmem:[#allocation5 + $0x7c4] ss:$80 sps:$4 sm:$0xff]  }
 0x1d2   :  { %v3952_v44 = vmax.f32 %v3932_v35, 0.0  ;;  %v3954_v45 = vmax.f32 %v3934_v36, 0.0  ;;  %v5263_v21 = vld [vmem:[#allocation5 + $0x7cc] ss:$80 sps:$4 sm:$0xff]   ;;  %v5258_v22 = vld [vmem:[#allocation5 + $0x7c0] ss:$80 sps:$4 sm:$0xff]  }
 0x1d3   :  { %vm5598_vm4 = vcmp.le.f32.partialorder %v3951_v39, 2.0  ;;  %v3991_v47 = vsub.f32 1.0, %v3951_v39  ;;  %vm5602_vm5 = vcmp.le.f32.partialorder %v3953_v40, 2.0  ;;  %v3993_v50 = vsub.f32 1.0, %v3953_v40  ;;  %v5261_v23 = vld [vmem:[#allocation5 + $0x7c8] ss:$80 sps:$4 sm:$0xff]  }
 0x1d4   :  { %vm5606_vm6 = vcmp.le.f32.partialorder %v3952_v44, 2.0  ;;  %v3992_v54 = vsub.f32 1.0, %v3952_v44  ;;  %vm5610_vm7 = vcmp.le.f32.partialorder %v3954_v45, 2.0  ;;  %v3994_v59 = vsub.f32 1.0, %v3954_v45  ;;  %3612 = vmatpush1.bf16.msra.mxu0 %v5228_v37  ;;  %3694 = vmatpush1.bf16.msra.mxu1 %v5231_v38  ;;  %v5266_v24 = vld [vmem:[#allocation5 + $0x864] ss:$80 sps:$4 sm:$0xff]  }
 0x1d5   :  { %v4011_v61 = vsel %vm5598_vm4, %v3991_v47, 0.0  ;;  %v4013_v62 = vsel %vm5602_vm5, %v3993_v50, 0.0  ;;  %3613 = vmatprep.subr.bf16.mxu0 %v5236_v41  ;;  %3695 = vmatprep.subr.bf16.mxu1 %v5239_v43  ;;  %v5269_v25 = vld [vmem:[#allocation5 + $0x86c] ss:$80 sps:$4 sm:$0xff]   ;;  %v5264_v26 = vld [vmem:[#allocation5 + $0x860] ss:$80 sps:$4 sm:$0xff]  }
 0x1d6   :  { %4031 = vst [vmem:[#allocation8 + $0x20] sm:$0xff] %v4011_v61  ;;  %4033 = vst [vmem:[#allocation8 + $0x30] sm:$0xff] %v4013_v62  ;;  %v4012_v1 = vsel %vm5606_vm6, %v3992_v54, 0.0  ;;  %v4014_v2 = vsel %vm5610_vm7, %v3994_v59, 0.0  ;;  %v5267_v27 = vld [vmem:[#allocation5 + $0x868] ss:$80 sps:$4 sm:$0xff]  }
 0x1d7   :  { %4032 = vst [vmem:[#allocation8 + $0x28] sm:$0xff] %v4012_v1  ;;  %4034 = vst [vmem:[#allocation8 + $0x38] sm:$0xff] %v4014_v2  ;;  %v5272_v13 = vld [vmem:[#allocation5 + $0x904] ss:$80 sps:$4 sm:$0xff]   ;;  %v5275_v28 = vld [vmem:[#allocation5 + $0x90c] ss:$80 sps:$4 sm:$0xff]  }
 0x1d8   :  { %3614 = vmatpush1.bf16.msra.mxu0 %v5234_v51  ;;  %3696 = vmatpush1.bf16.msra.mxu1 %v5237_v60  ;;  %v5270_v29 = vld [vmem:[#allocation5 + $0x900] ss:$80 sps:$4 sm:$0xff]   ;;  %v5273_v30 = vld [vmem:[#allocation5 + $0x908] ss:$80 sps:$4 sm:$0xff]   ;;  %v5278_v31 = vld [vmem:[#allocation5 + $0x9a4] ss:$80 sps:$4 sm:$0xff]  }
 0x1d9   :  { %3615 = vmatprep.subr.bf16.mxu0 %v5242_v63  ;;  %3697 = vmatprep.subr.bf16.mxu1 %v5245_v0  ;;  %v5281_v32 = vld [vmem:[#allocation5 + $0x9ac] ss:$80 sps:$4 sm:$0xff]   ;;  %v5276_v33 = vld [vmem:[#allocation5 + $0x9a0] ss:$80 sps:$4 sm:$0xff]   ;;  %v5279_v34 = vld [vmem:[#allocation5 + $0x9a8] ss:$80 sps:$4 sm:$0xff]  }
 0x1da   :  { %v5284_v35 = vld [vmem:[#allocation5 + $0xa44] ss:$80 sps:$4 sm:$0xff]   ;;  %v5287_v36 = vld [vmem:[#allocation5 + $0xa4c] ss:$80 sps:$4 sm:$0xff]   ;;  %v5282_v37 = vld [vmem:[#allocation5 + $0xa40] ss:$80 sps:$4 sm:$0xff]  }
 0x1db   :  { %v5285_v38 = vld [vmem:[#allocation5 + $0xa48] ss:$80 sps:$4 sm:$0xff]   ;;  %v5290_v39 = vld [vmem:[#allocation5 + $0xae4] ss:$80 sps:$4 sm:$0xff]   ;;  %v5293_v40 = vld [vmem:[#allocation5 + $0xaec] ss:$80 sps:$4 sm:$0xff]  }
 0x1dc   :  { %3616 = vmatpush1.bf16.msra.mxu0 %v5240_v3  ;;  %3698 = vmatpush1.bf16.msra.mxu1 %v5243_v4  ;;  %v5288_v41 = vld [vmem:[#allocation5 + $0xae0] ss:$80 sps:$4 sm:$0xff]   ;;  %v5291_v43 = vld [vmem:[#allocation5 + $0xae8] ss:$80 sps:$4 sm:$0xff]   ;;  %v5296_v44 = vld [vmem:[#allocation5 + $0xb84] ss:$80 sps:$4 sm:$0xff]  }
 0x1dd   :  { %3617 = vmatprep.subr.bf16.mxu0 %v5248_v5  ;;  %3699 = vmatprep.subr.bf16.mxu1 %v5251_v6  ;;  %v5299_v45 = vld [vmem:[#allocation5 + $0xb8c] ss:$80 sps:$4 sm:$0xff]   ;;  %v5297_v47 = vld [vmem:[#allocation5 + $0xb88] ss:$80 sps:$4 sm:$0xff]   ;;  %v5300_v50 = vld [vmem:[#allocation5 + $0xc20] ss:$80 sps:$4 sm:$0xff]  }
 0x1de   :  { %v5303_v51 = vld [vmem:[#allocation5 + $0xc28] ss:$80 sps:$4 sm:$0xff]   ;;  %v5311_v54 = vld [vmem:[#allocation5 + $0xccc] ss:$80 sps:$4 sm:$0xff]   ;;  %v5314_v59 = vld [vmem:[#allocation5 + $0xd64] ss:$80 sps:$4 sm:$0xff]  }
 0x1df   :  { %v5317_v60 = vld [vmem:[#allocation5 + $0xd6c] ss:$80 sps:$4 sm:$0xff]   ;;  %v5312_v61 = vld [vmem:[#allocation5 + $0xd60] ss:$80 sps:$4 sm:$0xff]   ;;  %v5315_v62 = vld [vmem:[#allocation5 + $0xd68] ss:$80 sps:$4 sm:$0xff]  }
 0x1e0   :  { %3618 = vmatpush1.bf16.msra.mxu0 %v5246_v7  ;;  %3700 = vmatpush1.bf16.msra.mxu1 %v5249_v9  ;;  %v5320_v63 = vld [vmem:[#allocation5 + $0xe04] ss:$80 sps:$4 sm:$0xff]   ;;  %v5323_v0 = vld [vmem:[#allocation5 + $0xe0c] ss:$80 sps:$4 sm:$0xff]   ;;  %v5318_v1 = vld [vmem:[#allocation5 + $0xe00] ss:$80 sps:$4 sm:$0xff]  }
 0x1e1   :  { %3619 = vmatprep.subr.bf16.mxu0 %v5254_v10  ;;  %3701 = vmatprep.subr.bf16.mxu1 %v5257_v11  ;;  %v5321_v2 = vld [vmem:[#allocation5 + $0xe08] ss:$80 sps:$4 sm:$0xff]   ;;  %v5326_v3 = vld [vmem:[#allocation5 + $0xea4] ss:$80 sps:$4 sm:$0xff]   ;;  %v5329_v4 = vld [vmem:[#allocation5 + $0xeac] ss:$80 sps:$4 sm:$0xff]  }
 0x1e2   :  { %v5324_v5 = vld [vmem:[#allocation5 + $0xea0] ss:$80 sps:$4 sm:$0xff]   ;;  %v5327_v6 = vld [vmem:[#allocation5 + $0xea8] ss:$80 sps:$4 sm:$0xff]  }
 0x1e3   :  { %v3762_v7 = vld [vmem:[#allocation7 + $0x8] sm:$0xff] }
 0x1e4   :  { %3620 = vmatpush1.bf16.msra.mxu0 %v5252_v12  ;;  %3702 = vmatpush1.bf16.msra.mxu1 %v5255_v17  ;;  %v3802_v9 = vrot.slane %v3762_v7, %v5531_v14  ;;  %v3810_v10 = vrot.slane %v3762_v7, %v5534_v16  ;;  %v3806_v17 = vrot.slane %v3762_v7, %v5537_v19 }
 0x1e5   :  { %3621 = vmatprep.subr.bf16.mxu0 %v5260_v18  ;;  %3703 = vmatprep.subr.bf16.mxu1 %v5263_v21  ;;  %v3814_v18 = vrot.slane %v3762_v7, %v5540_v20 }
 0x1e8   :  { %3622 = vmatpush1.bf16.msra.mxu0 %v5258_v22  ;;  %3704 = vmatpush1.bf16.msra.mxu1 %v5261_v23 }
 0x1e9   :  { %3623 = vmatprep.subr.bf16.mxu0 %v5266_v24  ;;  %3705 = vmatprep.subr.bf16.mxu1 %v5269_v25 }
 0x1ec   :  { %3624 = vmatpush1.bf16.msra.mxu0 %v5264_v26  ;;  %3706 = vmatpush1.bf16.msra.mxu1 %v5267_v27 }
 0x1ed   :  { %3625 = vmatprep.subr.bf16.mxu0 %v5272_v13  ;;  %3707 = vmatprep.subr.bf16.mxu1 %v5275_v28 }
 0x1f0   :  { %3626 = vmatpush1.bf16.msra.mxu0 %v5270_v29  ;;  %3708 = vmatpush1.bf16.msra.mxu1 %v5273_v30 }
 0x1f1   :  { %3627 = vmatprep.subr.bf16.mxu0 %v5278_v31  ;;  %3709 = vmatprep.subr.bf16.mxu1 %v5281_v32 }
 0x1f4   :  { %3628 = vmatpush1.bf16.msra.mxu0 %v5276_v33  ;;  %3710 = vmatpush1.bf16.msra.mxu1 %v5279_v34 }
 0x1f5   :  { %3638 = vmatprep.subr.bf16.mxu0 %v5284_v35  ;;  %3720 = vmatprep.subr.bf16.mxu1 %v5287_v36 }
 0x1f7   :  { %3630 = vmatmul.mubr.bf16.vlgmr.msra.gmra.mrb[16].mxu0 %v5487_v48  ;;  %3712 = vmatmul.mubr.bf16.vlgmr.msra.gmra.mrb[16].mxu1 %v5487_v48  ;;  %v5305_v48 = vld [vmem:[#allocation5 + $0xc2c] ss:$80 sps:$4 sm:$0xff]  }
 0x1f8   :  { %3639 = vmatpush1.bf16.msra.mxu0 %v5282_v37  ;;  %3721 = vmatpush1.bf16.msra.mxu1 %v5285_v38 }
 0x1f9   :  { %3640 = vmatprep.subr.bf16.mxu0 %v5290_v39  ;;  %3722 = vmatprep.subr.bf16.mxu1 %v5293_v40 }
 0x1fa   :  { %3670 = vmatprep.mubr.bf16.mxu0 %v5429_v15  ;;  %3752 = vmatprep.mubr.bf16.mxu1 %v5429_v15  ;;  %v5309_v15 = vld [vmem:[#allocation5 + $0xcc8] ss:$80 sps:$4 sm:$0xff]  }
 0x1fc   :  { %3641 = vmatpush1.bf16.msra.mxu0 %v5288_v41  ;;  %3723 = vmatpush1.bf16.msra.mxu1 %v5291_v43 }
 0x1fd   :  { %3642 = vmatprep.subr.bf16.mxu0 %v5296_v44  ;;  %3724 = vmatprep.subr.bf16.mxu1 %v5299_v45 }
 0x200   :  { %3643 = vmatpush1.bf16.msra.mxu0 %v5294_v46  ;;  %3725 = vmatpush1.bf16.msra.mxu1 %v5297_v47 }
 0x201   :  { %3644 = vmatprep.subr.bf16.mxu0 %v5302_v49  ;;  %3726 = vmatprep.subr.bf16.mxu1 %v5305_v48 }
 0x204   :  { %3645 = vmatpush1.bf16.msra.mxu0 %v5300_v50  ;;  %3727 = vmatpush1.bf16.msra.mxu1 %v5303_v51 }
 0x205   :  { %3646 = vmatprep.subr.bf16.mxu0 %v5308_v58  ;;  %3728 = vmatprep.subr.bf16.mxu1 %v5311_v54 }
 0x208   :  { %3647 = vmatpush1.bf16.msra.mxu0 %v5306_v55  ;;  %3729 = vmatpush1.bf16.msra.mxu1 %v5309_v15  ;;  %v3818_v55 = vrot.slane %v3762_v7, %v3785_v52  ;;  %v3826_v15 = vrot.slane %v3762_v7, %v3793_v53 }
 0x209   :  { %3648 = vmatprep.subr.bf16.mxu0 %v5314_v59  ;;  %3730 = vmatprep.subr.bf16.mxu1 %v5317_v60 }
 0x20c   :  { %3649 = vmatpush1.bf16.msra.mxu0 %v5312_v61  ;;  %3731 = vmatpush1.bf16.msra.mxu1 %v5315_v62  ;;  %v3822_v61 = vrot.slane %v3762_v7, %v3789_v56  ;;  %v3830_v62 = vrot.slane %v3762_v7, %v3797_v57 }
 0x20d   :  { %3650 = vmatprep.subr.bf16.mxu0 %v5320_v63  ;;  %3732 = vmatprep.subr.bf16.mxu1 %v5323_v0 }
 0x210   :  { %3651 = vmatpush1.bf16.msra.mxu0 %v5318_v1  ;;  %3733 = vmatpush1.bf16.msra.mxu1 %v5321_v2 }
 0x211   :  { %3652 = vmatprep.subr.bf16.mxu0 %v5326_v3  ;;  %3734 = vmatprep.subr.bf16.mxu1 %v5329_v4 }
 0x214   :  { %3653 = vmatpush1.bf16.msra.mxu0 %v5324_v5  ;;  %3735 = vmatpush1.bf16.msra.mxu1 %v5327_v6 }
 0x217   :  { %3671 = vmatmul.mubr.bf16.vlgmr.msra.gmra.mrb[16].mxu0 %v5504_v42  ;;  %3753 = vmatmul.mubr.bf16.vlgmr.msra.gmra.mrb[16].mxu1 %v5504_v42 }
 0x22a   :  { %v3344_v11 = vpop.f32.mrb[8].mxu0  ;;  %v3426_v12 = vpop.f32.mrb[8].mxu1 }
 0x22b   :  { %v4551_v21 = vadd.f32 -2.0, %v3344_v11  ;;  %v4553_v22 = vadd.f32 -2.0, %v3426_v12  ;;  %v3346_v23 = vpop.f32.mrb[9].mxu0  ;;  %v3428_v24 = vpop.f32.mrb[9].mxu1  ;;  %v3875_v42 = vsub.f32 %v3802_v9, %v3344_v11  ;;  %v3877_v29 = vsub.f32 %v3810_v10, %v3426_v12 }
 0x22c   :  { %v4552_v25 = vadd.f32 -2.0, %v3346_v23  ;;  %v4554_v26 = vadd.f32 -2.0, %v3428_v24  ;;  %v3348_v27 = vpop.f32.mrb[10].mxu0  ;;  %v3430_v13 = vpop.f32.mrb[10].mxu1  ;;  %v3876_v33 = vsub.f32 %v3806_v17, %v3346_v23  ;;  %v3878_v35 = vsub.f32 %v3814_v18, %v3428_v24 }
 0x22d   :  { %v3915_v28 = vsub.f32 %v4551_v21, %v3802_v9  ;;  %v3917_v30 = vsub.f32 %v4553_v22, %v3810_v10  ;;  %v3349_v31 = vpop.f32.mrb[11].mxu0  ;;  %v3431_v32 = vpop.f32.mrb[11].mxu1 }
 0x22e   :  { %v3916_v34 = vsub.f32 %v4552_v25, %v3806_v17  ;;  %v3918_v36 = vsub.f32 %v4554_v26, %v3814_v18 }
 0x22f   :  { %v3935_v37 = vmax.f32 %v3875_v42, %v3915_v28  ;;  %v3937_v38 = vmax.f32 %v3877_v29, %v3917_v30 }
 0x230   :  { %v3936_v39 = vmax.f32 %v3876_v33, %v3916_v34  ;;  %v3938_v40 = vmax.f32 %v3878_v35, %v3918_v36  ;;  %v3763_v33 = vld [vmem:[#allocation7 + $0x10] sm:$0xf] }
 0x231   :  { %v3955_v41 = vmax.f32 %v3935_v37, 0.0  ;;  %v3957_v43 = vmax.f32 %v3937_v38, 0.0  ;;  %v3834_v34 = vrot.slane %v3763_v33, %v5531_v14  ;;  %v3842_v35 = vrot.slane %v3763_v33, %v5534_v16 }
 0x232   :  { %v3956_v44 = vmax.f32 %v3936_v39, 0.0  ;;  %v3958_v45 = vmax.f32 %v3938_v40, 0.0  ;;  %v3838_v38 = vrot.slane %v3763_v33, %v5537_v19  ;;  %v3846_v39 = vrot.slane %v3763_v33, %v5540_v20 }
 0x233   :  { %vm3975_vm8 = vcmp.le.f32.partialorder %v3955_v41, 2.0  ;;  %v3995_v46 = vsub.f32 1.0, %v3955_v41  ;;  %vm3977_vm9 = vcmp.le.f32.partialorder %v3957_v43, 2.0  ;;  %v3997_v47 = vsub.f32 1.0, %v3957_v43 }
 0x234   :  { %vm3976_vm10 = vcmp.le.f32.partialorder %v3956_v44, 2.0  ;;  %v3996_v49 = vsub.f32 1.0, %v3956_v44  ;;  %vm3978_vm11 = vcmp.le.f32.partialorder %v3958_v45, 2.0  ;;  %v3998_v48 = vsub.f32 1.0, %v3958_v45 }
 0x235   :  { %v4015_v50 = vsel %vm3975_vm8, %v3995_v46, 0.0  ;;  %v4017_v51 = vsel %vm3977_vm9, %v3997_v47, 0.0 }
 0x236   :  { %4035 = vst [vmem:[#allocation8 + $0x40] sm:$0xff] %v4015_v50  ;;  %4037 = vst [vmem:[#allocation8 + $0x50] sm:$0xff] %v4017_v51  ;;  %v4016_v58 = vsel %vm3976_vm10, %v3996_v49, 0.0  ;;  %v4018_v54 = vsel %vm3978_vm11, %v3998_v48, 0.0 }
 0x237   :  { %4036 = vst [vmem:[#allocation8 + $0x48] sm:$0xff] %v4016_v58  ;;  %4038 = vst [vmem:[#allocation8 + $0x58] sm:$0xff] %v4018_v54 }
 0x28a   :  { %v3508_v59 = vpop.f32.mrb[12].mxu0  ;;  %v3590_v60 = vpop.f32.mrb[12].mxu1 }
 0x28b   :  { %v4555_v63 = vadd.f32 -2.0, %v3508_v59  ;;  %v4557_v0 = vadd.f32 -2.0, %v3590_v60  ;;  %v3510_v1 = vpop.f32.mrb[13].mxu0  ;;  %v3592_v2 = vpop.f32.mrb[13].mxu1  ;;  %v3879_v52 = vsub.f32 %v3818_v55, %v3508_v59  ;;  %v3881_v10 = vsub.f32 %v3826_v15, %v3590_v60 }
 0x28c   :  { %v4556_v3 = vadd.f32 -2.0, %v3510_v1  ;;  %v4558_v4 = vadd.f32 -2.0, %v3592_v2  ;;  %v3512_v5 = vpop.f32.mrb[14].mxu0  ;;  %v3594_v6 = vpop.f32.mrb[14].mxu1  ;;  %v3880_v17 = vsub.f32 %v3822_v61, %v3510_v1  ;;  %v3882_v56 = vsub.f32 %v3830_v62, %v3592_v2 }
 0x28d   :  { %v3919_v9 = vsub.f32 %v4555_v63, %v3818_v55  ;;  %v3921_v53 = vsub.f32 %v4557_v0, %v3826_v15  ;;  %v3513_v11 = vpop.f32.mrb[15].mxu0  ;;  %v3595_v12 = vpop.f32.mrb[15].mxu1 }
 0x28e   :  { %v3920_v18 = vsub.f32 %v4556_v3, %v3822_v61  ;;  %v3922_v21 = vsub.f32 %v4558_v4, %v3830_v62 }
 0x28f   :  { %v3939_v8 = vmax.f32 %v3879_v52, %v3919_v9  ;;  %v3941_v57 = vmax.f32 %v3881_v10, %v3921_v53 }
 0x290   :  { %v3940_v7 = vmax.f32 %v3880_v17, %v3920_v18  ;;  %v3942_v22 = vmax.f32 %v3882_v56, %v3922_v21 }
 0x291   :  { %v3959_v23 = vmax.f32 %v3939_v8, 0.0  ;;  %v3961_v24 = vmax.f32 %v3941_v57, 0.0 }
 0x292   :  { %v3960_v25 = vmax.f32 %v3940_v7, 0.0  ;;  %v3962_v26 = vmax.f32 %v3942_v22, 0.0 }
 0x293   :  { %vm3979_vm12 = vcmp.le.f32.partialorder %v3959_v23, 2.0  ;;  %v3999_v27 = vsub.f32 1.0, %v3959_v23  ;;  %vm3981_vm13 = vcmp.le.f32.partialorder %v3961_v24, 2.0  ;;  %v4001_v13 = vsub.f32 1.0, %v3961_v24 }
 0x294   :  { %vm3980_vm14 = vcmp.le.f32.partialorder %v3960_v25, 2.0  ;;  %v4000_v42 = vsub.f32 1.0, %v3960_v25  ;;  %vm3982_vm15 = vcmp.le.f32.partialorder %v3962_v26, 2.0  ;;  %v4002_v28 = vsub.f32 1.0, %v3962_v26 }
 0x295   :  { %v4019_v29 = vsel %vm3979_vm12, %v3999_v27, 0.0  ;;  %v4021_v30 = vsel %vm3981_vm13, %v4001_v13, 0.0 }
 0x296   :  { %4039 = vst [vmem:[#allocation8 + $0x60] sm:$0xff] %v4019_v29  ;;  %4041 = vst [vmem:[#allocation8 + $0x70] sm:$0xff] %v4021_v30  ;;  %v4020_v31 = vsel %vm3980_vm14, %v4000_v42, 0.0  ;;  %v4022_v32 = vsel %vm3982_vm15, %v4002_v28, 0.0 }
 0x297   :  { %4040 = vst [vmem:[#allocation8 + $0x68] sm:$0xff] %v4020_v31  ;;  %4042 = vst [vmem:[#allocation8 + $0x78] sm:$0xff] %v4022_v32 }
 0x2ea   :  { %v3672_v36 = vpop.f32.mrb[16].mxu0  ;;  %v3754_v37 = vpop.f32.mrb[16].mxu1 }
 0x2eb   :  { %v4559_v40 = vadd.f32 -2.0, %v3672_v36  ;;  %v4561_v41 = vadd.f32 -2.0, %v3754_v37  ;;  %v3674_v43 = vpop.f32.mrb[17].mxu0  ;;  %v3756_v44 = vpop.f32.mrb[17].mxu1  ;;  %v3883_v48 = vsub.f32 %v3834_v34, %v3672_v36  ;;  %v3885_v51 = vsub.f32 %v3842_v35, %v3754_v37 }
 0x2ec   :  { %v4560_v45 = vadd.f32 -2.0, %v3674_v43  ;;  %v4562_v46 = vadd.f32 -2.0, %v3756_v44  ;;  %v3676_v47 = vpop.f32.mrb[18].mxu0  ;;  %v3758_v49 = vpop.f32.mrb[18].mxu1  ;;  %v3884_v54 = vsub.f32 %v3838_v38, %v3674_v43  ;;  %v3886_v15 = vsub.f32 %v3846_v39, %v3756_v44 }
 0x2ed   :  { %v3923_v50 = vsub.f32 %v4559_v40, %v3834_v34  ;;  %v3925_v14 = vsub.f32 %v4561_v41, %v3842_v35  ;;  %v3677_v58 = vpop.f32.mrb[19].mxu0  ;;  %v3759_v16 = vpop.f32.mrb[19].mxu1 }
 0x2ee   :  { %v3924_v55 = vsub.f32 %v4560_v45, %v3838_v38  ;;  %v3926_v19 = vsub.f32 %v4562_v46, %v3846_v39 }
 0x2ef   :  { %v3943_v59 = vmax.f32 %v3883_v48, %v3923_v50  ;;  %v3945_v20 = vmax.f32 %v3885_v51, %v3925_v14 }
 0x2f0   :  { %v3944_v60 = vmax.f32 %v3884_v54, %v3924_v55  ;;  %v3946_v61 = vmax.f32 %v3886_v15, %v3926_v19 }
 0x2f1   :  { %v3963_v62 = vmax.f32 %v3943_v59, 0.0  ;;  %v3965_v63 = vmax.f32 %v3945_v20, 0.0 }
 0x2f2   :  { %v3964_v0 = vmax.f32 %v3944_v60, 0.0  ;;  %v3966_v1 = vmax.f32 %v3946_v61, 0.0 }
 0x2f3   :  { %vm3983_vm0 = vcmp.le.f32.partialorder %v3963_v62, 2.0  ;;  %v4003_v2 = vsub.f32 1.0, %v3963_v62  ;;  %vm3985_vm1 = vcmp.le.f32.partialorder %v3965_v63, 2.0  ;;  %v4005_v3 = vsub.f32 1.0, %v3965_v63 }
 0x2f4   :  { %vm3984_vm2 = vcmp.le.f32.partialorder %v3964_v0, 2.0  ;;  %v4004_v4 = vsub.f32 1.0, %v3964_v0  ;;  %vm3986_vm3 = vcmp.le.f32.partialorder %v3966_v1, 2.0  ;;  %v4006_v5 = vsub.f32 1.0, %v3966_v1 }
 0x2f5   :  { %v4023_v6 = vsel %vm3983_vm0, %v4003_v2, 0.0  ;;  %v4025_v52 = vsel %vm3985_vm1, %v4005_v3, 0.0 }
 0x2f6   :  { %4043 = vst [vmem:[#allocation8 + $0x80] sm:$0xff] %v4023_v6  ;;  %4045 = vst [vmem:[#allocation8 + $0x90] sm:$0xff] %v4025_v52  ;;  %v4024_v9 = vsel %vm3984_vm2, %v4004_v4, 0.0  ;;  %v4026_v10 = vsel %vm3986_vm3, %v4006_v5, 0.0 }
 0x2f7   :  { %4044 = vst [vmem:[#allocation8 + $0x88] sm:$0xff] %v4024_v9  ;;  %4046 = vst [vmem:[#allocation8 + $0x98] sm:$0xff] %v4026_v10 }
 0x2f8   :  { %5407 = shalt.err (!%p5404_p0)
}
 0x2f9   :  { %s5408_s25 = scalar_lea.hbm %s5659_s3, 2560 }
 0x2fa   :  { %p5409_p1 = scmp.ne.s32.totalorder %s5659_s3, %s5408_s25  ;;  %p5412_p2 = scmp.lt.u32.totalorder %s5408_s25, %s5659_s3 }
 0x2fc   :  { %p5414_p3 = pnand %p5412_p2, %p5409_p1 }
 0x2fe   :  { %5417 = shalt.err (!%p5414_p3)
}
 0x2ff   :  { %4056 = dma.vmem_to_hbm [thread:$0]  %s4054_s21, 2560, %s5659_s3, [#allocation4]  }
 0x300   :  { %5422 = dma.done.wait [#allocation4], 2560  }
 0x301   :  { %5423 = vsyncadd [#allocation4], 4294964736 }
 0x302   :  { %4060 = vsyncpa [#allocation3], 1 }
 0x303   :  { %4061 = vsyncpa [#allocation6], 1 }
 0x304   :  { %4062 = vsyncpa [#allocation4], 1 }

</bundles_post_ra>
